<compile_context>
chip_gen: v5e
topology: v5e:2x2
jax: 0.10.0
libtpu: 0.0.40
codegen_flags: <defaults>
</compile_context>

<pallas_src>
import functools

import numpy as np
import jax
import jax.numpy as jnp
from jax import lax
from jax.experimental import pallas as pl
from jax.experimental.pallas import tpu as pltpu

LANE = 128


def _round_up(v, m):
    return (v + m - 1) // m * m


# ------------------------------ Pallas kernel ------------------------------

def _aux_head_kernel(x_ref, pm_ref, w1_ref, w2_ref, w3_ref, b3_ref, o_ref,
                     *, tb, c, hw):
    # x_ref : (TB, C, HW)     NCHW activations, spatial flattened (free view)
    # pm_ref: (HW, 4)         pooling matrix, f32 (column p = 1/25 over window p)
    # w1_ref: (C, 128)        1x1 conv weight, bf16
    # w2_ref: (4, 128, 768)   2x2 conv taps [kh*2+kw, cin, cout], bf16
    # w3_ref: (768, NCOL)     classifier weight, zero-padded to 128 lanes, bf16
    # b3_ref: (1, NCOL)       classifier bias, zero-padded, f32
    # o_ref : (TB, NCOL)      logits, lane-dense
    xr = jnp.maximum(x_ref[...], 0.0)                              # ReLU, f32

    # AvgPool2d(5, stride=3, pad=0, count_include_pad=False irrelevant at
    # pad=0): a single (TB*C, HW) @ (HW, 4) matmul, exact in f32.
    pooled = jnp.dot(xr.reshape(tb * c, hw), pm_ref[...],
                     preferred_element_type=jnp.float32)           # (TB*C, 4)
    pooled = pooled.reshape(tb, c, 4)
    pooled = jnp.swapaxes(pooled, 1, 2)                            # (TB, 4, C)

    n_out2 = w2_ref.shape[2]
    acc = jnp.zeros((tb, n_out2), jnp.float32)
    for p in range(4):                                             # 4 taps
        tap = pooled[:, p].astype(jnp.bfloat16)                    # (TB, C)
        # Conv2d(C, 128, 1)
        h1 = jnp.dot(tap, w1_ref[...],
                     preferred_element_type=jnp.float32)           # (TB, 128)
        h1 = jnp.maximum(h1, 0.0).astype(jnp.bfloat16)
        # Conv2d(128, 768, 2) == sum over the 4 spatial taps
        acc = acc + jnp.dot(h1, w2_ref[p],
                            preferred_element_type=jnp.float32)    # (TB, 768)
    h2 = jnp.maximum(acc, 0.0).astype(jnp.bfloat16)

    # Linear(768, num_classes) against the lane-padded weight/bias.
    logits = jnp.dot(h2, w3_ref[...],
                     preferred_element_type=jnp.float32) + b3_ref[...]
    o_ref[...] = logits


# ------------------------------ host wrapper -------------------------------

def _pool_matrix_T(H, W):
    """(H*W, oh*ow) matrix: column p has 1/25 over the p-th 5x5/stride-3 win."""
    oh = (H - 5) // 3 + 1
    ow = (W - 5) // 3 + 1
    pm = np.zeros((H * W, oh * ow), np.float32)
    for i in range(oh):
        for j in range(ow):
            p = i * ow + j
            for dh in range(5):
                for dw in range(5):
                    pm[(i * 3 + dh) * W + (j * 3 + dw), p] = 1.0 / 25.0
    return pm, oh, ow


def _pick_batch_tile(n):
    tb = min(256, _round_up(n, 8))
    # Keep >= 2 grid steps when the batch is big enough so both v7x
    # TensorCores get work under dimension_semantics=("parallel",).
    if n > 128 and tb >= n:
        tb = _round_up(pl.cdiv(n, 2), 8)
    return tb


def aux_head_forward(params, x_nchw):
    N, C, H, W = x_nchw.shape
    if C % 8 != 0:
        raise ValueError("aux_head_forward requires C to be a multiple of 8")
    pm_np, oh, ow = _pool_matrix_T(H, W)
    assert oh == 2 and ow == 2, "AuxiliaryHeadCIFAR assumes an 8x8 input"
    HW = H * W
    ncls = params["w3"].shape[1]
    ncol = _round_up(ncls, LANE)

    # bf16 weights for the MXU; classifier padded to 128 output lanes so the
    # final matmul and the output store are lane-dense.
    w1 = params["w1"].astype(jnp.bfloat16)                       # (C, 128)
    w2 = params["w2"].astype(jnp.bfloat16)                       # (4, 128, 768)
    w3p = jnp.zeros((768, ncol), jnp.bfloat16).at[:, :ncls].set(
        params["w3"].astype(jnp.bfloat16))
    b3p = jnp.zeros((1, ncol), jnp.float32).at[:, :ncls].set(
        params["b3"].astype(jnp.float32).reshape(1, ncls))
    pm = jnp.asarray(pm_np)                                      # (HW, 4) f32

    # Free view (no NCHW->NHWC transpose, no extra HBM round trip).
    x = x_nchw.reshape(N, C, HW)

    TB = _pick_batch_tile(N)
    grid = (pl.cdiv(N, TB),)

    flops = 2 * N * (4 * HW * C + 4 * C * 128 + 4 * 128 * 768 + 768 * ncol)
    bytes_accessed = (x.size * 4 + N * ncol * 4 + w1.size * 2 + w2.size * 2 +
                      w3p.size * 2 + pm.size * 4 + b3p.size * 4)

    kernel = functools.partial(_aux_head_kernel, tb=TB, c=C, hw=HW)

    out = pl.pallas_call(
        kernel,
        out_shape=jax.ShapeDtypeStruct((N, ncol), jnp.float32),
        grid_spec=pltpu.PrefetchScalarGridSpec(
            num_scalar_prefetch=0,
            grid=grid,
            in_specs=[
                pl.BlockSpec((TB, C, HW), lambda b: (b, 0, 0)),      # x
                pl.BlockSpec((HW, 4), lambda b: (0, 0)),             # pool mat
                pl.BlockSpec((C, 128), lambda b: (0, 0)),            # w1
                pl.BlockSpec((4, 128, 768), lambda b: (0, 0, 0)),    # w2
                pl.BlockSpec((768, ncol), lambda b: (0, 0)),         # w3 (pad)
                pl.BlockSpec((1, ncol), lambda b: (0, 0)),           # b3 (pad)
            ],
            out_specs=pl.BlockSpec((TB, ncol), lambda b: (b, 0)),
        ),
        compiler_params=pltpu.CompilerParams(
            dimension_semantics=("parallel",),
            vmem_limit_bytes=32 * 1024 * 1024,
        ),
        cost_estimate=pl.CostEstimate(flops=flops, transcendentals=0,
                                      bytes_accessed=bytes_accessed),
    )(x, pm, w1, w2, w3p, b3p)
    return out[:, :ncls]


# ------------------------------- parameters --------------------------------

def init_params(key, C, num_classes):
    k = jax.random.split(key, 4)
    # w2 layout: [kh*2+kw, cin, cout]  <->  torch weight[cout, cin, kh, kw]
    return dict(
        w1=0.1 * jax.random.normal(k[0], (C, 128), jnp.float32),
        w2=0.05 * jax.random.normal(k[1], (4, 128, 768), jnp.float32),
        w3=0.05 * jax.random.normal(k[2], (768, num_classes), jnp.float32),
        b3=0.1 * jax.random.normal(k[3], (1, num_classes), jnp.float32),
    )


# --------------------------- pure-JAX reference ----------------------------

def ref_forward(params, x_nchw):
    N = x_nchw.shape[0]
    x = jnp.maximum(x_nchw, 0.0)
    # AvgPool2d(5, stride=3, padding=0): no padding -> plain mean over 25.
    x = lax.reduce_window(x, 0.0, lax.add,
                          window_dimensions=(1, 1, 5, 5),
                          window_strides=(1, 1, 3, 3),
                          padding="VALID") / 25.0                    # (N,C,2,2)
    x = jnp.einsum("nchw,cd->ndhw", x, params["w1"],
                   precision=lax.Precision.HIGHEST)                  # (N,128,2,2)
    x = jnp.maximum(x, 0.0)
    xs = jnp.transpose(x, (0, 2, 3, 1)).reshape(N, 4, 128)           # taps row-major
    h2 = jnp.einsum("npc,pco->no", xs, params["w2"],
                    precision=lax.Precision.HIGHEST)                 # (N, 768)
    h2 = jnp.maximum(h2, 0.0)
    return jnp.dot(h2, params["w3"],
                   precision=lax.Precision.HIGHEST) + params["b3"]   # (N, ncls)


# ---------------------------------- main ------------------------------------

if __name__ == "__main__":
    N, C, H, W, NUM_CLASSES = 2, 16, 8, 8, 10
    key = jax.random.PRNGKey(0)
    kx, kp = jax.random.split(key)
    x = jax.random.normal(kx, (N, C, H, W), jnp.float32)
    params = init_params(kp, C, NUM_CLASSES)

    out = jax.jit(aux_head_forward)(params, x)
    out = jax.block_until_ready(out)
    assert out.shape == (N, NUM_CLASSES), out.shape

    ref = jax.block_until_ready(ref_forward(params, x))
    # bf16 MXU operands (f32 accumulation) -> slightly looser tolerance than
    # the pure-f32 reference.
    np.testing.assert_allclose(np.asarray(out), np.asarray(ref),
                               rtol=2e-2, atol=2e-2)
    print("KERNEL_OK")
</pallas_src>

<mosaic_0001>
module attributes {stable_mosaic.version = 11 : i64} {
  func.func @_aux_head_kernel(%arg0: i32, %arg1: memref<8x16x64xf32, #tpu.memory_space<vmem>>, %arg2: memref<64x4xf32, #tpu.memory_space<vmem>>, %arg3: memref<16x128xbf16, #tpu.memory_space<vmem>>, %arg4: memref<4x128x768xbf16, #tpu.memory_space<vmem>>, %arg5: memref<768x128xbf16, #tpu.memory_space<vmem>>, %arg6: memref<1x128xf32, #tpu.memory_space<vmem>>, %arg7: memref<8x128xf32, #tpu.memory_space<vmem>>) attributes {dimension_semantics = [#tpu.dimension_semantics<parallel>], iteration_bounds = array<i64: 1>, scalar_prefetch = 0 : i64, scratch_operands = 0 : i64, tpu.core_type = #tpu.core_type<tc>, window_params = [{transform_indices = @transform_0, window_bounds = array<i64: 8, 16, 64>}, {pipeline_mode = #tpu.pipeline_mode<synchronous>, transform_indices = @transform_1, window_bounds = array<i64: 64, 4>}, {pipeline_mode = #tpu.pipeline_mode<synchronous>, transform_indices = @transform_2, window_bounds = array<i64: 16, 128>}, {pipeline_mode = #tpu.pipeline_mode<synchronous>, transform_indices = @transform_3, window_bounds = array<i64: 4, 128, 768>}, {pipeline_mode = #tpu.pipeline_mode<synchronous>, transform_indices = @transform_4, window_bounds = array<i64: 768, 128>}, {pipeline_mode = #tpu.pipeline_mode<synchronous>, transform_indices = @transform_5, window_bounds = array<i64: 1, 128>}, {transform_indices = @transform_6, window_bounds = array<i64: 8, 128>}]} {
    %c0 = arith.constant 0 : index
    %c0_0 = arith.constant 0 : index
    %c0_1 = arith.constant 0 : index
    %0 = vector.load %arg1[%c0, %c0_0, %c0_1] : memref<8x16x64xf32, #tpu.memory_space<vmem>>, vector<8x16x64xf32>
    %cst = arith.constant 0.000000e+00 : f32
    %1 = vector.broadcast %cst : f32 to vector<8x16x64xf32>
    %2 = arith.maximumf %0, %1 : vector<8x16x64xf32>
    %3 = vector.shape_cast %2 : vector<8x16x64xf32> to vector<128x64xf32>
    %c0_2 = arith.constant 0 : index
    %c0_3 = arith.constant 0 : index
    %4 = vector.load %arg2[%c0_2, %c0_3] : memref<64x4xf32, #tpu.memory_space<vmem>>, vector<64x4xf32>
    %cst_4 = arith.constant dense<0.000000e+00> : vector<128x4xf32>
    %5 = tpu.matmul %3, %4, %cst_4 {dimension_numbers = #tpu.dot_dimension_numbers<[1], [0], [0], [1], [0, 0, 1, 1], [], []>} : vector<128x64xf32>, vector<64x4xf32>, vector<128x4xf32> -> vector<128x4xf32>
    %6 = vector.shape_cast %5 : vector<128x4xf32> to vector<8x16x4xf32>
    %7 = tpu.transpose %6, [0, 2, 1] : vector<8x16x4xf32> -> vector<8x4x16xf32>
    %cst_5 = arith.constant 0.000000e+00 : f32
    %8 = vector.broadcast %cst_5 : f32 to vector<8x768xf32>
    %9 = vector.extract_strided_slice %7 {offsets = [0, 0, 0], sizes = [8, 1, 16], strides = [1, 1, 1]} : vector<8x4x16xf32> to vector<8x1x16xf32>
    %10 = vector.shape_cast %9 : vector<8x1x16xf32> to vector<8x16xf32>
    %11 = arith.truncf %10 : vector<8x16xf32> to vector<8x16xbf16>
    %c0_6 = arith.constant 0 : index
    %c0_7 = arith.constant 0 : index
    %12 = vector.load %arg3[%c0_6, %c0_7] : memref<16x128xbf16, #tpu.memory_space<vmem>>, vector<16x128xbf16>
    %cst_8 = arith.constant dense<0.000000e+00> : vector<8x128xf32>
    %13 = tpu.matmul %11, %12, %cst_8 {dimension_numbers = #tpu.dot_dimension_numbers<[1], [0], [0], [1], [0, 0, 1, 1], [], []>} : vector<8x16xbf16>, vector<16x128xbf16>, vector<8x128xf32> -> vector<8x128xf32>
    %cst_9 = arith.constant 0.000000e+00 : f32
    %14 = vector.broadcast %cst_9 : f32 to vector<8x128xf32>
    %15 = arith.maximumf %13, %14 : vector<8x128xf32>
    %16 = arith.truncf %15 : vector<8x128xf32> to vector<8x128xbf16>
    %c0_10 = arith.constant 0 : index
    %c0_11 = arith.constant 0 : index
    %c0_12 = arith.constant 0 : index
    %17 = vector.load %arg4[%c0_10, %c0_11, %c0_12] : memref<4x128x768xbf16, #tpu.memory_space<vmem>>, vector<1x128x768xbf16>
    %18 = vector.shape_cast %17 : vector<1x128x768xbf16> to vector<128x768xbf16>
    %cst_13 = arith.constant dense<0.000000e+00> : vector<8x768xf32>
    %19 = tpu.matmul %16, %18, %cst_13 {dimension_numbers = #tpu.dot_dimension_numbers<[1], [0], [0], [1], [0, 0, 1, 1], [], []>} : vector<8x128xbf16>, vector<128x768xbf16>, vector<8x768xf32> -> vector<8x768xf32>
    %20 = arith.addf %8, %19 : vector<8x768xf32>
    %21 = vector.extract_strided_slice %7 {offsets = [0, 1, 0], sizes = [8, 1, 16], strides = [1, 1, 1]} : vector<8x4x16xf32> to vector<8x1x16xf32>
    %22 = vector.shape_cast %21 : vector<8x1x16xf32> to vector<8x16xf32>
    %23 = arith.truncf %22 : vector<8x16xf32> to vector<8x16xbf16>
    %c0_14 = arith.constant 0 : index
    %c0_15 = arith.constant 0 : index
    %24 = vector.load %arg3[%c0_14, %c0_15] : memref<16x128xbf16, #tpu.memory_space<vmem>>, vector<16x128xbf16>
    %cst_16 = arith.constant dense<0.000000e+00> : vector<8x128xf32>
    %25 = tpu.matmul %23, %24, %cst_16 {dimension_numbers = #tpu.dot_dimension_numbers<[1], [0], [0], [1], [0, 0, 1, 1], [], []>} : vector<8x16xbf16>, vector<16x128xbf16>, vector<8x128xf32> -> vector<8x128xf32>
    %cst_17 = arith.constant 0.000000e+00 : f32
    %26 = vector.broadcast %cst_17 : f32 to vector<8x128xf32>
    %27 = arith.maximumf %25, %26 : vector<8x128xf32>
    %28 = arith.truncf %27 : vector<8x128xf32> to vector<8x128xbf16>
    %c1 = arith.constant 1 : index
    %c0_18 = arith.constant 0 : index
    %c0_19 = arith.constant 0 : index
    %29 = vector.load %arg4[%c1, %c0_18, %c0_19] : memref<4x128x768xbf16, #tpu.memory_space<vmem>>, vector<1x128x768xbf16>
    %30 = vector.shape_cast %29 : vector<1x128x768xbf16> to vector<128x768xbf16>
    %cst_20 = arith.constant dense<0.000000e+00> : vector<8x768xf32>
    %31 = tpu.matmul %28, %30, %cst_20 {dimension_numbers = #tpu.dot_dimension_numbers<[1], [0], [0], [1], [0, 0, 1, 1], [], []>} : vector<8x128xbf16>, vector<128x768xbf16>, vector<8x768xf32> -> vector<8x768xf32>
    %32 = arith.addf %20, %31 : vector<8x768xf32>
    %33 = vector.extract_strided_slice %7 {offsets = [0, 2, 0], sizes = [8, 1, 16], strides = [1, 1, 1]} : vector<8x4x16xf32> to vector<8x1x16xf32>
    %34 = vector.shape_cast %33 : vector<8x1x16xf32> to vector<8x16xf32>
    %35 = arith.truncf %34 : vector<8x16xf32> to vector<8x16xbf16>
    %c0_21 = arith.constant 0 : index
    %c0_22 = arith.constant 0 : index
    %36 = vector.load %arg3[%c0_21, %c0_22] : memref<16x128xbf16, #tpu.memory_space<vmem>>, vector<16x128xbf16>
    %cst_23 = arith.constant dense<0.000000e+00> : vector<8x128xf32>
    %37 = tpu.matmul %35, %36, %cst_23 {dimension_numbers = #tpu.dot_dimension_numbers<[1], [0], [0], [1], [0, 0, 1, 1], [], []>} : vector<8x16xbf16>, vector<16x128xbf16>, vector<8x128xf32> -> vector<8x128xf32>
    %cst_24 = arith.constant 0.000000e+00 : f32
    %38 = vector.broadcast %cst_24 : f32 to vector<8x128xf32>
    %39 = arith.maximumf %37, %38 : vector<8x128xf32>
    %40 = arith.truncf %39 : vector<8x128xf32> to vector<8x128xbf16>
    %c2 = arith.constant 2 : index
    %c0_25 = arith.constant 0 : index
    %c0_26 = arith.constant 0 : index
    %41 = vector.load %arg4[%c2, %c0_25, %c0_26] : memref<4x128x768xbf16, #tpu.memory_space<vmem>>, vector<1x128x768xbf16>
    %42 = vector.shape_cast %41 : vector<1x128x768xbf16> to vector<128x768xbf16>
    %cst_27 = arith.constant dense<0.000000e+00> : vector<8x768xf32>
    %43 = tpu.matmul %40, %42, %cst_27 {dimension_numbers = #tpu.dot_dimension_numbers<[1], [0], [0], [1], [0, 0, 1, 1], [], []>} : vector<8x128xbf16>, vector<128x768xbf16>, vector<8x768xf32> -> vector<8x768xf32>
    %44 = arith.addf %32, %43 : vector<8x768xf32>
    %45 = vector.extract_strided_slice %7 {offsets = [0, 3, 0], sizes = [8, 1, 16], strides = [1, 1, 1]} : vector<8x4x16xf32> to vector<8x1x16xf32>
    %46 = vector.shape_cast %45 : vector<8x1x16xf32> to vector<8x16xf32>
    %47 = arith.truncf %46 : vector<8x16xf32> to vector<8x16xbf16>
    %c0_28 = arith.constant 0 : index
    %c0_29 = arith.constant 0 : index
    %48 = vector.load %arg3[%c0_28, %c0_29] : memref<16x128xbf16, #tpu.memory_space<vmem>>, vector<16x128xbf16>
    %cst_30 = arith.constant dense<0.000000e+00> : vector<8x128xf32>
    %49 = tpu.matmul %47, %48, %cst_30 {dimension_numbers = #tpu.dot_dimension_numbers<[1], [0], [0], [1], [0, 0, 1, 1], [], []>} : vector<8x16xbf16>, vector<16x128xbf16>, vector<8x128xf32> -> vector<8x128xf32>
    %cst_31 = arith.constant 0.000000e+00 : f32
    %50 = vector.broadcast %cst_31 : f32 to vector<8x128xf32>
    %51 = arith.maximumf %49, %50 : vector<8x128xf32>
    %52 = arith.truncf %51 : vector<8x128xf32> to vector<8x128xbf16>
    %c3 = arith.constant 3 : index
    %c0_32 = arith.constant 0 : index
    %c0_33 = arith.constant 0 : index
    %53 = vector.load %arg4[%c3, %c0_32, %c0_33] : memref<4x128x768xbf16, #tpu.memory_space<vmem>>, vector<1x128x768xbf16>
    %54 = vector.shape_cast %53 : vector<1x128x768xbf16> to vector<128x768xbf16>
    %cst_34 = arith.constant dense<0.000000e+00> : vector<8x768xf32>
    %55 = tpu.matmul %52, %54, %cst_34 {dimension_numbers = #tpu.dot_dimension_numbers<[1], [0], [0], [1], [0, 0, 1, 1], [], []>} : vector<8x128xbf16>, vector<128x768xbf16>, vector<8x768xf32> -> vector<8x768xf32>
    %56 = arith.addf %44, %55 : vector<8x768xf32>
    %cst_35 = arith.constant 0.000000e+00 : f32
    %57 = vector.broadcast %cst_35 : f32 to vector<8x768xf32>
    %58 = arith.maximumf %56, %57 : vector<8x768xf32>
    %59 = arith.truncf %58 : vector<8x768xf32> to vector<8x768xbf16>
    %c0_36 = arith.constant 0 : index
    %c0_37 = arith.constant 0 : index
    %60 = vector.load %arg5[%c0_36, %c0_37] : memref<768x128xbf16, #tpu.memory_space<vmem>>, vector<768x128xbf16>
    %cst_38 = arith.constant dense<0.000000e+00> : vector<8x128xf32>
    %61 = tpu.matmul %59, %60, %cst_38 {dimension_numbers = #tpu.dot_dimension_numbers<[1], [0], [0], [1], [0, 0, 1, 1], [], []>} : vector<8x768xbf16>, vector<768x128xbf16>, vector<8x128xf32> -> vector<8x128xf32>
    %c0_39 = arith.constant 0 : index
    %c0_40 = arith.constant 0 : index
    %62 = vector.load %arg6[%c0_39, %c0_40] : memref<1x128xf32, #tpu.memory_space<vmem>>, vector<1x128xf32>
    %63 = vector.broadcast %62 : vector<1x128xf32> to vector<8x128xf32>
    %64 = arith.addf %61, %63 : vector<8x128xf32>
    %c0_41 = arith.constant 0 : index
    %c0_42 = arith.constant 0 : index
    %65 = vector.load %arg7[%c0_41, %c0_42] : memref<8x128xf32, #tpu.memory_space<vmem>>, vector<8x128xf32>
    tpu.vector_store %arg7[%c0_41, %c0_42], %64 {strides = array<i32>} : memref<8x128xf32, #tpu.memory_space<vmem>>, vector<8x128xf32>,
    return
  }
  func.func @transform_0(%arg0: i32) -> (i32, i32, i32) {
    %c0_i32 = arith.constant 0 : i32
    %c0_i32_0 = arith.constant 0 : i32
    %c0_i32_1 = arith.constant 0 : i32
    return %arg0, %c0_i32, %c0_i32_0 : i32, i32, i32
  }
  func.func @transform_1(%arg0: i32) -> (i32, i32) {
    %c0_i32 = arith.constant 0 : i32
    %c0_i32_0 = arith.constant 0 : i32
    %c0_i32_1 = arith.constant 0 : i32
    return %c0_i32, %c0_i32_0 : i32, i32
  }
  func.func @transform_2(%arg0: i32) -> (i32, i32) {
    %c0_i32 = arith.constant 0 : i32
    %c0_i32_0 = arith.constant 0 : i32
    %c0_i32_1 = arith.constant 0 : i32
    return %c0_i32, %c0_i32_0 : i32, i32
  }
  func.func @transform_3(%arg0: i32) -> (i32, i32, i32) {
    %c0_i32 = arith.constant 0 : i32
    %c0_i32_0 = arith.constant 0 : i32
    %c0_i32_1 = arith.constant 0 : i32
    %c0_i32_2 = arith.constant 0 : i32
    return %c0_i32, %c0_i32_0, %c0_i32_1 : i32, i32, i32
  }
  func.func @transform_4(%arg0: i32) -> (i32, i32) {
    %c0_i32 = arith.constant 0 : i32
    %c0_i32_0 = arith.constant 0 : i32
    %c0_i32_1 = arith.constant 0 : i32
    return %c0_i32, %c0_i32_0 : i32, i32
  }
  func.func @transform_5(%arg0: i32) -> (i32, i32) {
    %c0_i32 = arith.constant 0 : i32
    %c0_i32_0 = arith.constant 0 : i32
    %c0_i32_1 = arith.constant 0 : i32
    return %c0_i32, %c0_i32_0 : i32, i32
  }
  func.func @transform_6(%arg0: i32) -> (i32, i32) {
    %c0_i32 = arith.constant 0 : i32
    %c0_i32_0 = arith.constant 0 : i32
    return %arg0, %c0_i32 : i32, i32
  }
}

</mosaic_0001>

<bundles_post_ra>
// kernel: aux_head_forward.1
= control target key start
LH: loop header
LB: loop body
LE: loop exit
PB: predicated region body
PF: predicated region fallthrough
CT: control target
= control target key end

     0   :  { %11 = vsyncpa [#allocation3], 0  ;;  %vm65_vm0 = vcmask 523264   ;;  %vm462_vm1 = vcmask 1041409   ;;  %vm465_vm2 = vcmask 1042434   ;;  %vm468_vm3 = vcmask 1043459   ;;  %s5613_s0 = inlined_call_operand.vmem [shape: f32[2,16,64], index: 0, kind: input, shape index: {}]   ;;  %s5614_s1 = inlined_call_operand.vmem [shape: f32[64,4], index: 1, kind: input, shape index: {}]   ;;  %s5615_s2 = inlined_call_operand.vmem [shape: bf16[16,128], index: 2, kind: input, shape index: {}]   ;;  %s5616_s3 = inlined_call_operand.vmem [shape: bf16[4,128,768], index: 3, kind: input, shape index: {}]   ;;  %s5617_s4 = inlined_call_operand.vmem [shape: bf16[768,128], index: 4, kind: input, shape index: {}]   ;;  %s5618_s5 = inlined_call_operand.vmem [shape: f32[1,128], index: 5, kind: input, shape index: {}]   ;;  %s5619_s6 = inlined_call_operand.hbm [shape: f32[2,128], index: 6, kind: output, shape index: {}]  }
   0x1   :  { %v64_v0 = vld [vmem:[%s5614_s1 + $0x38] sm:$0xff]  ;;  %v63_v1 = vld [vmem:[%s5614_s1 + $0x30] sm:$0xff]  ;;  %v62_v2 = vld [vmem:[%s5614_s1 + $0x28] sm:$0xff]  ;;  %vm471_vm4 = vcmask 1044484   ;;  %vm474_vm5 = vcmask 1045509   ;;  %vm477_vm6 = vcmask 1046534  }
   0x2   :  { %122 = vmatpush.msra.mxu0 %v64_v0  ;;  %v61_v3 = vld [vmem:[%s5614_s1 + $0x20] sm:$0xff]  ;;  %v60_v4 = vld [vmem:[%s5614_s1 + $0x18] sm:$0xff]  ;;  %v59_v5 = vld [vmem:[%s5614_s1 + $0x10] sm:$0xff]  ;;  %vm480_vm7 = vcmask 1047559   ;;  %vm489_vm8 = vcmask 130048  }
   0x3   :  { %v25_v6 = vld [vmem:[%s5613_s0] sm:$0xff]  ;;  %v58_v7 = vld [vmem:[%s5614_s1 + $0x8] sm:$0xff]  ;;  %v27_v12 = vld [vmem:[%s5613_s0 + $0x10] sm:$0xff] }
   0x4   :  { %123 = vmatpush.msra.mxu0 %v63_v1  ;;  %v57_v8 = vld [vmem:[%s5614_s1] sm:$0xff]  ;;  %v41_v9 = vmax.f32 %v25_v6, 0.0  ;;  %v26_v10 = vld [vmem:[%s5613_s0 + $0x8] sm:$0xff]  ;;  %v43_v13 = vmax.f32 %v27_v12, 0.0  ;;  %v28_v14 = vld [vmem:[%s5613_s0 + $0x18] sm:$0xff] }
   0x5   :  { %v42_v11 = vmax.f32 %v26_v10, 0.0  ;;  %v44_v15 = vmax.f32 %v28_v14, 0.0  ;;  %v29_v16 = vld [vmem:[%s5613_s0 + $0x20] sm:$0xff]  ;;  %v30_v18 = vld [vmem:[%s5613_s0 + $0x28] sm:$0xff]  ;;  %v31_v20 = vld [vmem:[%s5613_s0 + $0x30] sm:$0xff] }
   0x6   :  { %124 = vmatpush.msra.mxu0 %v62_v2  ;;  %v45_v17 = vmax.f32 %v29_v16, 0.0  ;;  %v46_v19 = vmax.f32 %v30_v18, 0.0  ;;  %v47_v21 = vmax.f32 %v31_v20, 0.0  ;;  %v32_v22 = vld [vmem:[%s5613_s0 + $0x38] sm:$0xff]  ;;  %v33_v24 = vld [vmem:[%s5613_s0 + $0x40] sm:$0xff]  ;;  %v34_v26 = vld [vmem:[%s5613_s0 + $0x48] sm:$0xff] }
   0x7   :  { %v48_v23 = vmax.f32 %v32_v22, 0.0  ;;  %v49_v25 = vmax.f32 %v33_v24, 0.0  ;;  %v50_v27 = vmax.f32 %v34_v26, 0.0  ;;  %v35_v28 = vld [vmem:[%s5613_s0 + $0x50] sm:$0xff]  ;;  %v36_v30 = vld [vmem:[%s5613_s0 + $0x58] sm:$0xff]  ;;  %v37_v32 = vld [vmem:[%s5613_s0 + $0x60] sm:$0xff] }
   0x8   :  { %125 = vmatpush.msra.mxu0 %v61_v3  ;;  %v51_v29 = vmax.f32 %v35_v28, 0.0  ;;  %v52_v31 = vmax.f32 %v36_v30, 0.0  ;;  %v53_v33 = vmax.f32 %v37_v32, 0.0  ;;  %v38_v34 = vld [vmem:[%s5613_s0 + $0x68] sm:$0xff]  ;;  %v39_v36 = vld [vmem:[%s5613_s0 + $0x70] sm:$0xff]  ;;  %v40_v38 = vld [vmem:[%s5613_s0 + $0x78] sm:$0xff] }
   0x9   :  { %v54_v35 = vmax.f32 %v38_v34, 0.0  ;;  %v55_v37 = vmax.f32 %v39_v36, 0.0  ;;  %v56_v39 = vmax.f32 %v40_v38, 0.0  ;;  %v3711_v58 = vld [vmem:[%s5615_s2] sm:$0xff] }
   0xa   :  { %126 = vmatpush.msra.mxu0 %v60_v4  ;;  %581 = vmatpush.bf16.msra.mxu2 %v3711_v58 }
   0xc   :  { %127 = vmatpush.msra.mxu0 %v59_v5 }
   0xe   :  { %128 = vmatpush.msra.mxu0 %v58_v7 }
  0x10   :  { %129 = vmatpush.msra.mxu0 %v57_v8 }
  0x11   :  { %2583 = vmatmul.msk.f32.vlgmr.msra.gmra.mxu0 %vm65_vm0, %v41_v9 }
  0x12   :  { %500 = vmatpush.bf16.msrb.mxu0 %v3711_v58 }
  0x16   :  { %1299 = vmatpush.bf16.msra.mxu0 %v3711_v58 }
  0x19   :  { %2584 = vmatmul.msk.f32.gmra.mxu0 %vm65_vm0, %v42_v11 }
  0x21   :  { %2585 = vmatmul.msk.f32.gmra.mxu0 %vm65_vm0, %v43_v13 }
  0x29   :  { %2586 = vmatmul.msk.f32.gmra.mxu0 %vm65_vm0, %v44_v15 }
  0x31   :  { %2587 = vmatmul.msk.f32.gmra.mxu0 %vm65_vm0, %v45_v17 }
  0x39   :  { %2588 = vmatmul.msk.f32.gmra.mxu0 %vm65_vm0, %v46_v19 }
  0x41   :  { %2589 = vmatmul.msk.f32.gmra.mxu0 %vm65_vm0, %v47_v21 }
  0x49   :  { %2590 = vmatmul.msk.f32.gmra.mxu0 %vm65_vm0, %v48_v23 }
  0x51   :  { %2591 = vmatmul.msk.f32.gmra.mxu0 %vm65_vm0, %v49_v25 }
  0x59   :  { %2592 = vmatmul.msk.f32.gmra.mxu0 %vm65_vm0, %v50_v27 }
  0x61   :  { %2593 = vmatmul.msk.f32.gmra.mxu0 %vm65_vm0, %v51_v29 }
  0x69   :  { %2594 = vmatmul.msk.f32.gmra.mxu0 %vm65_vm0, %v52_v31 }
  0x71   :  { %2595 = vmatmul.msk.f32.gmra.mxu0 %vm65_vm0, %v53_v33 }
  0x79   :  { %2596 = vmatmul.msk.f32.gmra.mxu0 %vm65_vm0, %v54_v35 }
  0x81   :  { %2597 = vmatmul.msk.f32.gmra.mxu0 %vm65_vm0, %v55_v37 }
  0x89   :  { %2598 = vmatmul.msk.f32.gmra.mxu0 %vm65_vm0, %v56_v39 }
  0x8e   :  { %v131_v40 = vpop.f32.mrf.mxu0 }
  0x96   :  { %v134_v41 = vpop.f32.mrf.mxu0 }
  0x9e   :  { %v137_v42 = vpop.f32.mrf.mxu0 }
  0xa6   :  { %v140_v43 = vpop.f32.mrf.mxu0 }
  0xae   :  { %v143_v44 = vpop.f32.mrf.mxu0 }
  0xaf   :  { %v3956_v45 = vpack.i.bf16 %v143_v44, %v131_v40 }
  0xb1   :  { %3957 = vxpose.xlu0.b32.start [1/2] (short) (narrow) %v3956_v45, 8  ;;  %v2823_v45 = vld [vmem:[%s5616_s3 + $0x2d0] sm:$0xf] }
  0xb6   :  { %v146_v46 = vpop.f32.mrf.mxu0 }
  0xb7   :  { %v3958_v47 = vpack.i.bf16 %v146_v46, %v134_v41  ;;  %v3805_v46 = vld [vmem:[%s5616_s3 + $0x2e4] sm:$0xf0] }
  0xb9   :  { %3959 = vxpose.xlu0.b32.end [2/2] (short) (narrow) %v3958_v47, 8  ;;  %v3802_v47 = vld [vmem:[%s5616_s3 + $0x2d4] sm:$0xf] }
  0xbe   :  { %v149_v48 = vpop.f32.mrf.mxu0 }
  0xbf   :  { %v3965_v49 = vpack.i.bf16 %v149_v48, %v137_v42  ;;  %v2824_v48 = vor.u32 %v3805_v46, %v2823_v45  ;;  %v3781_v45 = vld [vmem:[%s5616_s3 + $0x224] sm:$0xf0] }
  0xc1   :  { %3966 = vxpose.xlu1.b32.start [1/2] (short) (narrow) %v3965_v49, 8  ;;  %v2825_v49 = vld [vmem:[%s5616_s3 + $0x2e8] sm:$0xf0]  ;;  %878 = vmatpush.bf16.msra.mxu3 %v2824_v48  ;;  %v3778_v48 = vld [vmem:[%s5616_s3 + $0x214] sm:$0xf] }
  0xc6   :  { %v152_v50 = vpop.f32.mrf.mxu0 }
  0xc7   :  { %v3967_v51 = vpack.i.bf16 %v152_v50, %v140_v43  ;;  %v2831_v50 = vld [vmem:[%s5616_s3 + $0x2d8] sm:$0xf] }
  0xc9   :  { %3968 = vxpose.xlu1.b32.end [2/2] (short) (narrow) %v3967_v51, 8  ;;  %v3806_v51 = vld [vmem:[%s5616_s3 + $0x2ec] sm:$0xf0] }
  0xce   :  { %v155_v52 = vpop.f32.mrf.mxu0 }
  0xd6   :  { %v158_v53 = vpop.f32.mrf.mxu0 }
  0xde   :  { %v161_v54 = vpop.f32.mrf.mxu0 }
  0xdf   :  { %v3974_v55 = vpack.i.bf16 %v161_v54, %v155_v52  ;;  %v2828_v52 = vor.u32 %v3802_v47, %v2825_v49  ;;  %v2799_v54 = vld [vmem:[%s5616_s3 + $0x2a0] sm:$0xf]  ;;  %v2729_v49 = vld [vmem:[%s5616_s3 + $0x228] sm:$0xf0] }
  0xe1   :  { %3975 = vxpose.xlu2.b32.start [1/2] (short) (narrow) %v3974_v55, 8  ;;  %v3799_v55 = vld [vmem:[%s5616_s3 + $0x2b4] sm:$0xf0]  ;;  %891 = vmatpush.bf16.msra.mxu1 %v2828_v52 }
  0xe6   :  { %v164_v56 = vpop.f32.mrf.mxu0 }
  0xe7   :  { %v3976_v57 = vpack.i.bf16 %v164_v56, %v158_v53  ;;  %v2832_v53 = vor.u32 %v3806_v51, %v2831_v50  ;;  %v3796_v56 = vld [vmem:[%s5616_s3 + $0x2a4] sm:$0xf] }
  0xe9   :  { %3977 = vxpose.xlu2.b32.end [2/2] (short) (narrow) %v3976_v57, 8  ;;  %904 = vmatpush.bf16.msrb.mxu2 %v2832_v53 }
  0xee   :  { %v167_v59 = vpop.f32.mrf.mxu0 }
  0xf6   :  { %v170_v60 = vpop.f32.mrf.mxu0 }
  0xfe   :  { %v173_v61 = vpop.f32.mrf.mxu0 }
  0xff   :  { %v3983_v62 = vpack.i.bf16 %v173_v61, %v167_v59  ;;  %v2801_v61 = vld [vmem:[%s5616_s3 + $0x2b8] sm:$0xf0] }
 0x101   :  { %3984 = vxpose.xlu0.b32.start [1/2] (short) (narrow) %v3983_v62, 8  ;;  %v2807_v62 = vld [vmem:[%s5616_s3 + $0x2a8] sm:$0xf] }
 0x106   :  { %v176_v63 = vpop.f32.mrf.mxu0 }
 0x107   :  { %v3985_v0 = vpack.i.bf16 %v176_v63, %v170_v60  ;;  %v2800_v60 = vor.u32 %v3799_v55, %v2799_v54  ;;  %v3800_v63 = vld [vmem:[%s5616_s3 + $0x2bc] sm:$0xf0] }
 0x109   :  { %3986 = vxpose.xlu0.b32.end [2/2] (short) (narrow) %v3985_v0, 8  ;;  %879 = vmatpush.bf16.msra.mxu3 %v2800_v60  ;;  %v2703_v60 = vld [vmem:[%s5616_s3 + $0x1e0] sm:$0xf] }
 0x155   :  { %v3960_v1 = vpop.trf.xlu0 }
 0x156   :  { %v3964_v2 = vunpack.i.h.bf16 %v3960_v1  ;;  %v3961_v3 = vunpack.i.l.bf16 %v3960_v1 }
 0x158   :  { %v437_v4 = vpack.c.bf16 %v3964_v2, %v3964_v2  ;;  %v435_v5 = vpack.c.bf16 %v3961_v3, %v3961_v3  ;;  %v2775_v2 = vld [vmem:[%s5616_s3 + $0x270] sm:$0xf]  ;;  %v3793_v3 = vld [vmem:[%s5616_s3 + $0x284] sm:$0xf0] }
 0x15a   :  { %v4149_v9 = vunpack.c.l.b16 %v437_v4  ;;  %v4151_v11 = vunpack.c.l.b16 %v435_v5  ;;  %v3790_v4 = vld [vmem:[%s5616_s3 + $0x274] sm:$0xf]  ;;  %v2804_v5 = vor.u32 %v3796_v56, %v2801_v61  ;;  %v2735_v56 = vld [vmem:[%s5616_s3 + $0x218] sm:$0xf] }
 0x15b   :  { %v3775_v61 = vld [vmem:[%s5616_s3 + $0x1f4] sm:$0xf0] }
 0x15c   :  { %v1680_v12 = vrot.slane %v4151_v11, 3  ;;  %v1683_v15 = vrot.slane %v4149_v9, 1  ;;  %v464_v33 = vrot.slane %v4149_v9, 6  ;;  %v556_v34 = vrot.slane %v4151_v11, 1  ;;  %892 = vmatpush.bf16.msra.mxu1 %v2804_v5  ;;  %v2711_v5 = vld [vmem:[%s5616_s3 + $0x1e8] sm:$0xf] }
 0x15d   :  { %v558_v36 = vrot.slane %v4149_v9, 7  ;;  %v1274_v37 = vrot.slane %v4151_v11, 2 }
 0x165   :  { %v3969_v6 = vpop.trf.xlu1 }
 0x166   :  { %v3970_v7 = vunpack.i.l.bf16 %v3969_v6  ;;  %v3973_v8 = vunpack.i.h.bf16 %v3969_v6  ;;  %v2808_v6 = vor.u32 %v3800_v63, %v2807_v62  ;;  %v2705_v63 = vld [vmem:[%s5616_s3 + $0x1f8] sm:$0xf0] }
 0x168   :  { %v436_v10 = vpack.c.bf16 %v3970_v7, %v3970_v7  ;;  %v438_v13 = vpack.c.bf16 %v3973_v8, %v3973_v8  ;;  %v2777_v7 = vld [vmem:[%s5616_s3 + $0x288] sm:$0xf0]  ;;  %v2783_v8 = vld [vmem:[%s5616_s3 + $0x278] sm:$0xf]  ;;  %905 = vmatpush.bf16.msrb.mxu2 %v2808_v6  ;;  %v3776_v6 = vld [vmem:[%s5616_s3 + $0x1fc] sm:$0xf0] }
 0x16a   :  { %v4154_v14 = vunpack.c.l.b16 %v436_v10  ;;  %v4158_v17 = vunpack.c.l.b16 %v438_v13  ;;  %v3794_v10 = vld [vmem:[%s5616_s3 + $0x28c] sm:$0xf0] }
 0x16c   :  { %v1681_v16 = vrot.slane %v4154_v14, 2  ;;  %v461_v32 = vrot.slane %v4154_v14, 7  ;;  %v467_v38 = vrot.slane %v4158_v17, 5  ;;  %v560_v39 = vrot.slane %v4158_v17, 6 }
 0x16d   :  { %v1275_v40 = vrot.slane %v4154_v14, 1  ;;  %v557_v43 = vsel %vm462_vm1, %v4154_v14, %v556_v34 }
 0x16e   :  { %v1682_v18 = vsel %vm462_vm1, %v1681_v16, %v1680_v12  ;;  %v463_v35 = vsel %vm462_vm1, %v461_v32, %v4151_v11  ;;  %v559_v57 = vsel %vm465_vm2, %v558_v36, %v557_v43 }
 0x16f   :  { %v1684_v19 = vsel %vm465_vm2, %v1683_v15, %v1682_v18  ;;  %v466_v44 = vsel %vm465_vm2, %v464_v33, %v463_v35  ;;  %v561_v14 = vsel %vm468_vm3, %v560_v39, %v559_v57  ;;  %v1276_v15 = vsel %vm462_vm1, %v1275_v40, %v1274_v37  ;;  %v2759_v35 = vld [vmem:[%s5616_s3 + $0x248] sm:$0xf]  ;;  %v3782_v57 = vld [vmem:[%s5616_s3 + $0x22c] sm:$0xf0] }
 0x170   :  { %v1685_v20 = vsel %vm468_vm3, %v4158_v17, %v1684_v19  ;;  %v469_v59 = vsel %vm468_vm3, %v467_v38, %v466_v44  ;;  %v2776_v19 = vor.u32 %v3793_v3, %v2775_v2  ;;  %v1277_v32 = vsel %vm465_vm2, %v4149_v9, %v1276_v15  ;;  %v3788_v9 = vld [vmem:[%s5616_s3 + $0x25c] sm:$0xf0]  ;;  %v2727_v44 = vld [vmem:[%s5616_s3 + $0x210] sm:$0xf]  ;;  %v2687_v15 = vld [vmem:[%s5616_s3 + $0x1b8] sm:$0xf] }
 0x171   :  { %v1278_v40 = vrot.slane %v4158_v17, 7  ;;  %v2760_v53 = vor.u32 %v3788_v9, %v2759_v35  ;;  %v2728_v55 = vor.u32 %v3781_v45, %v2727_v44  ;;  %v3804_v44 = vld [vmem:[%s5616_s3 + $0x2e4] sm:$0xf]  ;;  %v2841_v45 = vld [vmem:[%s5616_s3 + $0x2f8] sm:$0xf0] }
 0x172   :  { %880 = vmatpush.bf16.msra.mxu3 %v2776_v19 }
 0x173   :  { %v1279_v62 = vsel %vm468_vm3, %v1278_v40, %v1277_v32  ;;  %v3803_v32 = vld [vmem:[%s5616_s3 + $0x2dc] sm:$0xf]  ;;  %v2663_v40 = vld [vmem:[%s5616_s3 + $0x188] sm:$0xf] }
 0x17a   :  { %v3978_v21 = vpop.trf.xlu2 }
 0x17b   :  { %v3979_v22 = vunpack.i.l.bf16 %v3978_v21  ;;  %v3982_v24 = vunpack.i.h.bf16 %v3978_v21 }
 0x17d   :  { %v439_v23 = vpack.c.bf16 %v3979_v22, %v3979_v22  ;;  %v440_v27 = vpack.c.bf16 %v3982_v24, %v3982_v24  ;;  %v2780_v22 = vor.u32 %v3790_v4, %v2777_v7  ;;  %v2751_v24 = vld [vmem:[%s5616_s3 + $0x240] sm:$0xf]  ;;  %v2704_v4 = vor.u32 %v3775_v61, %v2703_v60  ;;  %v3791_v61 = vld [vmem:[%s5616_s3 + $0x27c] sm:$0xf] }
 0x17f   :  { %v4164_v25 = vunpack.c.l.b16 %v439_v23  ;;  %v4168_v29 = vunpack.c.l.b16 %v440_v27  ;;  %v2784_v23 = vor.u32 %v3794_v10, %v2783_v8  ;;  %893 = vmatpush.bf16.msra.mxu1 %v2780_v22  ;;  %v3769_v10 = vld [vmem:[%s5616_s3 + $0x1c4] sm:$0xf0]  ;;  %v3266_v22 = vld [vmem:[%s5616_s3 + $0x470] sm:$0xf0] }
 0x181   :  { %v1686_v26 = vrot.slane %v4164_v25, 7  ;;  %v1688_v30 = vrot.slane %v4168_v29, 6  ;;  %v470_v41 = vrot.slane %v4164_v25, 4  ;;  %v562_v42 = vrot.slane %v4164_v25, 5  ;;  %906 = vmatpush.bf16.msrb.mxu2 %v2784_v23 }
 0x182   :  { %v473_v11 = vrot.slane %v4168_v29, 3  ;;  %v564_v16 = vrot.slane %v4168_v29, 4  ;;  %v1282_v3 = vrot.slane %v4168_v29, 5  ;;  %v2679_v29 = vld [vmem:[%s5616_s3 + $0x1b0] sm:$0xf] }
 0x183   :  { %v1687_v28 = vsel %vm471_vm4, %v1686_v26, %v1685_v20  ;;  %v472_v18 = vsel %vm471_vm4, %v470_v41, %v469_v59  ;;  %v3787_v26 = vld [vmem:[%s5616_s3 + $0x254] sm:$0xf0]  ;;  %v563_v27 = vsel %vm471_vm4, %v562_v42, %v561_v14  ;;  %v2732_v59 = vor.u32 %v3778_v48, %v2729_v49  ;;  %v3797_v48 = vld [vmem:[%s5616_s3 + $0x2ac] sm:$0xf]  ;;  %v3218_v49 = vld [vmem:[%s5616_s3 + $0x410] sm:$0xf0] }
 0x184   :  { %v4172_v31 = vsel %vm474_vm5, %v1688_v30, %v1687_v28  ;;  %v3784_v28 = vld [vmem:[%s5616_s3 + $0x244] sm:$0xf]  ;;  %v2753_v30 = vld [vmem:[%s5616_s3 + $0x258] sm:$0xf0]  ;;  %v475_v34 = vsel %vm474_vm5, %v473_v11, %v472_v18  ;;  %v2752_v39 = vor.u32 %v3787_v26, %v2751_v24  ;;  %v565_v42 = vsel %vm474_vm5, %v564_v16, %v563_v27  ;;  %v3766_v11 = vld [vmem:[%s5616_s3 + $0x1b4] sm:$0xf] }
 0x185   :  { %v2756_v43 = vor.u32 %v3784_v28, %v2753_v30  ;;  %907 = vmatpush.bf16.msrb.mxu2 %v2760_v53  ;;  %v2712_v14 = vor.u32 %v3776_v6, %v2711_v5  ;;  %v3770_v16 = vld [vmem:[%s5616_s3 + $0x1cc] sm:$0xf0]  ;;  %v2680_v19 = vor.u32 %v3769_v10, %v2679_v29  ;;  %v3763_v26 = vld [vmem:[%s5616_s3 + $0x194] sm:$0xf0]  ;;  %v3760_v27 = vld [vmem:[%s5616_s3 + $0x184] sm:$0xf] }
 0x186   :  { %881 = vmatpush.bf16.msra.mxu3 %v2752_v39  ;;  %v2657_v28 = vld [vmem:[%s5616_s3 + $0x198] sm:$0xf0]  ;;  %v2688_v35 = vor.u32 %v3770_v16, %v2687_v15  ;;  %v2815_v53 = vld [vmem:[%s5616_s3 + $0x2b0] sm:$0xf]  ;;  %v3785_v6 = vld [vmem:[%s5616_s3 + $0x24c] sm:$0xf] }
 0x187   :  { %894 = vmatpush.bf16.msra.mxu1 %v2756_v43  ;;  %v2660_v43 = vor.u32 %v3760_v27, %v2657_v28  ;;  %v3786_v10 = vld [vmem:[%s5616_s3 + $0x254] sm:$0xf]  ;;  %v2743_v16 = vld [vmem:[%s5616_s3 + $0x220] sm:$0xf]  ;;  %v2713_v27 = vld [vmem:[%s5616_s3 + $0x200] sm:$0xf0] }
 0x188   :  { %v2737_v15 = vld [vmem:[%s5616_s3 + $0x230] sm:$0xf0]  ;;  %v2719_v28 = vld [vmem:[%s5616_s3 + $0x1f0] sm:$0xf] }
 0x18a   :  { %882 = vmatpush.bf16.msra.mxu3 %v2728_v55 }
 0x18b   :  { %895 = vmatpush.bf16.msra.mxu1 %v2732_v59 }
 0x18e   :  { %883 = vmatpush.bf16.msra.mxu3 %v2704_v4 }
 0x192   :  { %884 = vmatpush.bf16.msra.mxu3 %v2680_v19 }
 0x1a5   :  { %v3987_v58 = vpop.trf.xlu0 }
 0x1a6   :  { %v3991_v0 = vunpack.i.h.bf16 %v3987_v58  ;;  %v3988_v1 = vunpack.i.l.bf16 %v3987_v58  ;;  %v1280_v58 = vrot.slane %v4164_v25, 6  ;;  %v3772_v25 = vld [vmem:[%s5616_s3 + $0x1e4] sm:$0xf] }
 0x1a7   :  { %v2708_v8 = vor.u32 %v3772_v25, %v2705_v63  ;;  %v2791_v25 = vld [vmem:[%s5616_s3 + $0x280] sm:$0xf]  ;;  %v3795_v63 = vld [vmem:[%s5616_s3 + $0x294] sm:$0xf0] }
 0x1a8   :  { %v442_v12 = vpack.c.bf16 %v3991_v0, %v3991_v0  ;;  %v441_v13 = vpack.c.bf16 %v3988_v1, %v3988_v1  ;;  %v2736_v1 = vor.u32 %v3782_v57, %v2735_v56  ;;  %v1281_v7 = vsel %vm471_vm4, %v1280_v58, %v1279_v62  ;;  %v3798_v57 = vld [vmem:[%s5616_s3 + $0x2b4] sm:$0xf]  ;;  %v2817_v58 = vld [vmem:[%s5616_s3 + $0x2c8] sm:$0xf0] }
 0x1a9   :  { %v1283_v18 = vsel %vm474_vm5, %v1282_v3, %v1281_v7  ;;  %896 = vmatpush.bf16.msra.mxu1 %v2708_v8  ;;  %v2844_v56 = vor.u32 %v3804_v44, %v2841_v45  ;;  %v2785_v62 = vld [vmem:[%s5616_s3 + $0x290] sm:$0xf0]  ;;  %v2793_v3 = vld [vmem:[%s5616_s3 + $0x298] sm:$0xf0]  ;;  %v2792_v5 = vor.u32 %v3795_v63, %v2791_v25  ;;  %v2761_v7 = vld [vmem:[%s5616_s3 + $0x260] sm:$0xf0] }
 0x1aa   :  { %v4250_v20 = vunpack.c.l.b16 %v442_v12  ;;  %v4252_v21 = vunpack.c.l.b16 %v441_v13  ;;  %v2681_v12 = vld [vmem:[%s5616_s3 + $0x1c8] sm:$0xf0]  ;;  %908 = vmatpush.bf16.msrb.mxu2 %v2736_v1  ;;  %v3792_v1 = vld [vmem:[%s5616_s3 + $0x284] sm:$0xf]  ;;  %v2788_v4 = vor.u32 %v3791_v61, %v2785_v62  ;;  %v3789_v8 = vld [vmem:[%s5616_s3 + $0x264] sm:$0xf0] }
 0x1ab   :  { %v2684_v24 = vor.u32 %v3766_v11, %v2681_v12  ;;  %v2796_v29 = vor.u32 %v3792_v1, %v2793_v3  ;;  %v2769_v11 = vld [vmem:[%s5616_s3 + $0x268] sm:$0xf0]  ;;  %v2764_v12 = vor.u32 %v3785_v6, %v2761_v7  ;;  %v3768_v44 = vld [vmem:[%s5616_s3 + $0x1c4] sm:$0xf]  ;;  %v2697_v45 = vld [vmem:[%s5616_s3 + $0x1d8] sm:$0xf0] }
 0x1ac   :  { %v476_v33 = vrot.slane %v4252_v21, 2  ;;  %v479_v36 = vrot.slane %v4250_v20, 1  ;;  %v566_v37 = vrot.slane %v4252_v21, 3  ;;  %v568_v38 = vrot.slane %v4250_v20, 2  ;;  %v3815_v62 = vld [vmem:[%s5616_s3 + $0x33c] sm:$0xf] }
 0x1ad   :  { %v1690_v46 = vrot.slane %v4252_v21, 5  ;;  %v1692_v50 = vrot.slane %v4250_v20, 4  ;;  %v1286_v13 = vrot.slane %v4250_v20, 3  ;;  %v3851_v20 = vld [vmem:[%s5616_s3 + $0x45c] sm:$0xf]  ;;  %897 = vmatpush.bf16.msra.mxu1 %v2684_v24  ;;  %v2772_v19 = vor.u32 %v3786_v10, %v2769_v11 }
 0x1ae   :  { %v478_v41 = vsel %vm477_vm6, %v476_v33, %v475_v34  ;;  %v567_v17 = vsel %vm477_vm6, %v566_v37, %v565_v42  ;;  %v3269_v30 = vor.u32 %v3851_v20, %v3266_v22  ;;  %v2833_v33 = vld [vmem:[%s5616_s3 + $0x2f0] sm:$0xf0]  ;;  %v2839_v34 = vld [vmem:[%s5616_s3 + $0x2e0] sm:$0xf]  ;;  %909 = vmatpush.bf16.msrb.mxu2 %v2712_v14  ;;  %v3845_v37 = vld [vmem:[%s5616_s3 + $0x42c] sm:$0xf] }
 0x1af   :  { %v481_v47 = vsel %vm480_vm7, %v479_v36, %v478_v41  ;;  %v569_v52 = vsel %vm480_vm7, %v568_v38, %v567_v17  ;;  %v1691_v0 = vsel %vm477_vm6, %v1690_v46, %v4172_v31  ;;  %v1284_v31 = vrot.slane %v4252_v21, 4  ;;  %v2655_v21 = vld [vmem:[%s5616_s3 + $0x180] sm:$0xf]  ;;  %v3807_v36 = vld [vmem:[%s5616_s3 + $0x2f4] sm:$0xf0] }
 0x1b0   :  { %v482_v51 = vpack.c.b16 %v481_v47, %v481_v47  ;;  %v570_v54 = vpack.c.b16 %v569_v52, %v569_v52  ;;  %v4325_v2 = vsel %vm480_vm7, %v1692_v50, %v1691_v0  ;;  %v3242_v38 = vld [vmem:[%s5616_s3 + $0x440] sm:$0xf0]  ;;  %v2656_v9 = vor.u32 %v3763_v26, %v2655_v21  ;;  %v3764_v41 = vld [vmem:[%s5616_s3 + $0x19c] sm:$0xf0]  ;;  %v3839_v46 = vld [vmem:[%s5616_s3 + $0x3fc] sm:$0xf] }
 0x1b1   :  { %v1285_v23 = vsel %vm477_vm6, %v1284_v31, %v1283_v18  ;;  %v3245_v42 = vor.u32 %v3845_v37, %v3242_v38  ;;  %v2836_v47 = vor.u32 %v3803_v32, %v2833_v33  ;;  %v2840_v17 = vor.u32 %v3807_v36, %v2839_v34  ;;  %v2809_v52 = vld [vmem:[%s5616_s3 + $0x2c0] sm:$0xf0]  ;;  %898 = vmatpush.bf16.msra.mxu1 %v2660_v43  ;;  %v2767_v31 = vld [vmem:[%s5616_s3 + $0x250] sm:$0xf]  ;;  %v3779_v14 = vld [vmem:[%s5616_s3 + $0x21c] sm:$0xf] }
 0x1b2   :  { %2603 = vmatmul.msk.bf16.vlgmr.msrb.gmra.mxu0 %vm489_vm8, %v482_v51  ;;  %2604 = vmatmul.msk.bf16.vlgmr.msra.gmra.mxu2 %vm489_vm8, %v570_v54  ;;  %v1287_v39 = vsel %vm480_vm7, %v1286_v13, %v1285_v23  ;;  %v2664_v51 = vor.u32 %v3764_v41, %v2663_v40  ;;  %v3801_v54 = vld [vmem:[%s5616_s3 + $0x2c4] sm:$0xf0]  ;;  %v3221_v55 = vor.u32 %v3839_v46, %v3218_v49  ;;  %v3783_v18 = vld [vmem:[%s5616_s3 + $0x234] sm:$0xf0]  ;;  %v3780_v21 = vld [vmem:[%s5616_s3 + $0x224] sm:$0xf] }
 0x1b3   :  { %1635 = vmatpush.bf16.msrb.mxu0 %v3269_v30  ;;  %v1288_v50 = vpack.c.b16 %v1287_v39, %v1287_v39  ;;  %910 = vmatpush.bf16.msrb.mxu2 %v2688_v35  ;;  %v2812_v59 = vor.u32 %v3797_v48, %v2809_v52  ;;  %v2816_v60 = vor.u32 %v3801_v54, %v2815_v53  ;;  %v2745_v20 = vld [vmem:[%s5616_s3 + $0x238] sm:$0xf0]  ;;  %v3773_v26 = vld [vmem:[%s5616_s3 + $0x1ec] sm:$0xf]  ;;  %v3777_v32 = vld [vmem:[%s5616_s3 + $0x204] sm:$0xf0] }
 0x1b4   :  { %885 = vmatpush.bf16.msra.mxu3 %v2656_v9  ;;  %v2820_v0 = vor.u32 %v3798_v57, %v2817_v58  ;;  %v2768_v13 = vor.u32 %v3789_v8, %v2767_v31  ;;  %v2740_v22 = vor.u32 %v3779_v14, %v2737_v15  ;;  %v2744_v23 = vor.u32 %v3783_v18, %v2743_v16  ;;  %v3774_v33 = vld [vmem:[%s5616_s3 + $0x1f4] sm:$0xf]  ;;  %v2721_v34 = vld [vmem:[%s5616_s3 + $0x208] sm:$0xf0]  ;;  %v3194_v38 = vld [vmem:[%s5616_s3 + $0x3e0] sm:$0xf0] }
 0x1b5   :  { %930 = vmatpush.bf16.msrb.mxu1 %v2840_v17  ;;  %v2748_v24 = vor.u32 %v3780_v21, %v2745_v20  ;;  %v2716_v30 = vor.u32 %v3773_v26, %v2713_v27  ;;  %v2720_v35 = vor.u32 %v3777_v32, %v2719_v28  ;;  %v2724_v36 = vor.u32 %v3774_v33, %v2721_v34  ;;  %v3833_v37 = vld [vmem:[%s5616_s3 + $0x3cc] sm:$0xf]  ;;  %v3767_v9 = vld [vmem:[%s5616_s3 + $0x1bc] sm:$0xf]  ;;  %v2689_v40 = vld [vmem:[%s5616_s3 + $0x1d0] sm:$0xf0] }
 0x1b6   :  { %v3197_v39 = vor.u32 %v3833_v37, %v3194_v38  ;;  %v2695_v41 = vld [vmem:[%s5616_s3 + $0x1c0] sm:$0xf]  ;;  %v3771_v43 = vld [vmem:[%s5616_s3 + $0x1d4] sm:$0xf0]  ;;  %v3827_v17 = vld [vmem:[%s5616_s3 + $0x39c] sm:$0xf] }
 0x1b7   :  { %1636 = vmatpush.bf16.msrb.mxu0 %v3245_v42  ;;  %911 = vmatpush.bf16.msrb.mxu2 %v2664_v51  ;;  %v2692_v42 = vor.u32 %v3767_v9, %v2689_v40  ;;  %v2696_v46 = vor.u32 %v3771_v43, %v2695_v41  ;;  %v3170_v48 = vld [vmem:[%s5616_s3 + $0x3b0] sm:$0xf0]  ;;  %v2665_v51 = vld [vmem:[%s5616_s3 + $0x1a0] sm:$0xf0]  ;;  %v2671_v52 = vld [vmem:[%s5616_s3 + $0x190] sm:$0xf] }
 0x1b8   :  { %917 = vmatpush.bf16.msrb.mxu3 %v2836_v47  ;;  %v2700_v47 = vor.u32 %v3768_v44, %v2697_v45  ;;  %v3173_v49 = vor.u32 %v3827_v17, %v3170_v48  ;;  %v3765_v54 = vld [vmem:[%s5616_s3 + $0x1a4] sm:$0xf0]  ;;  %v3122_v25 = vld [vmem:[%s5616_s3 + $0x350] sm:$0xf0]  ;;  %v3098_v1 = vld [vmem:[%s5616_s3 + $0x320] sm:$0xf0] }
 0x1b9   :  { %931 = vmatpush.bf16.msrb.mxu1 %v2816_v60  ;;  %v2672_v57 = vor.u32 %v3765_v54, %v2671_v52  ;;  %v3146_v60 = vld [vmem:[%s5616_s3 + $0x380] sm:$0xf0]  ;;  %v3125_v63 = vor.u32 %v3815_v62, %v3122_v25  ;;  %v3757_v6 = vld [vmem:[%s5616_s3 + $0x164] sm:$0xf0]  ;;  %v3754_v7 = vld [vmem:[%s5616_s3 + $0x154] sm:$0xf] }
 0x1ba   :  { %v3017_v8 = vld [vmem:[%s5616_s3 + $0x168] sm:$0xf0]  ;;  %v3758_v10 = vld [vmem:[%s5616_s3 + $0x16c] sm:$0xf0]  ;;  %v2991_v18 = vld [vmem:[%s5616_s3 + $0x120] sm:$0xf] }
 0x1bb   :  { %1637 = vmatpush.bf16.msrb.mxu0 %v3221_v55  ;;  %943 = vmatpush.bf16.msra.mxu2 %v2844_v56  ;;  %v3762_v55 = vld [vmem:[%s5616_s3 + $0x194] sm:$0xf]  ;;  %v2673_v56 = vld [vmem:[%s5616_s3 + $0x1a8] sm:$0xf0]  ;;  %v3020_v15 = vor.u32 %v3754_v7, %v3017_v8  ;;  %v3748_v21 = vld [vmem:[%s5616_s3 + $0x124] sm:$0xf] }
 0x1bc   :  { %918 = vmatpush.bf16.msrb.mxu3 %v2812_v59  ;;  %v2676_v58 = vor.u32 %v3762_v55, %v2673_v56  ;;  %v3821_v59 = vld [vmem:[%s5616_s3 + $0x36c] sm:$0xf]  ;;  %v2993_v20 = vld [vmem:[%s5616_s3 + $0x138] sm:$0xf0]  ;;  %v2967_v28 = vld [vmem:[%s5616_s3 + $0xf0] sm:$0xf] }
 0x1bd   :  { %932 = vmatpush.bf16.msrb.mxu1 %v2792_v5  ;;  %v3149_v61 = vor.u32 %v3821_v59, %v3146_v60  ;;  %v3015_v5 = vld [vmem:[%s5616_s3 + $0x150] sm:$0xf]  ;;  %v2996_v26 = vor.u32 %v3748_v21, %v2993_v20  ;;  %v3742_v32 = vld [vmem:[%s5616_s3 + $0xf4] sm:$0xf]  ;;  %v2969_v34 = vld [vmem:[%s5616_s3 + $0x108] sm:$0xf0] }
 0x1be   :  { %v2972_v9 = vor.u32 %v3742_v32, %v2969_v34  ;;  %v2943_v41 = vld [vmem:[%s5616_s3 + $0xc0] sm:$0xf]  ;;  %v3736_v43 = vld [vmem:[%s5616_s3 + $0xc4] sm:$0xf]  ;;  %v2945_v45 = vld [vmem:[%s5616_s3 + $0xd8] sm:$0xf0] }
 0x1bf   :  { %944 = vmatpush.bf16.msra.mxu2 %v2820_v0  ;;  %1638 = vmatpush.bf16.msrb.mxu0 %v3197_v39  ;;  %v3809_v0 = vld [vmem:[%s5616_s3 + $0x30c] sm:$0xf]  ;;  %v2948_v48 = vor.u32 %v3736_v43, %v2945_v45  ;;  %v3730_v52 = vld [vmem:[%s5616_s3 + $0x94] sm:$0xf]  ;;  %v2927_v54 = vld [vmem:[%s5616_s3 + $0x98] sm:$0xf] }
 0x1c0   :  { %919 = vmatpush.bf16.msrb.mxu3 %v2788_v4  ;;  %v3101_v3 = vor.u32 %v3809_v0, %v3098_v1  ;;  %v3734_v55 = vld [vmem:[%s5616_s3 + $0xac] sm:$0xf0]  ;;  %v2895_v60 = vld [vmem:[%s5616_s3 + $0x60] sm:$0xf]  ;;  %v3724_v62 = vld [vmem:[%s5616_s3 + $0x64] sm:$0xf] }
 0x1c1   :  { %933 = vmatpush.bf16.msrb.mxu1 %v2768_v13  ;;  %v3016_v13 = vor.u32 %v3757_v6, %v3015_v5  ;;  %v2928_v59 = vor.u32 %v3734_v55, %v2927_v54  ;;  %v2897_v25 = vld [vmem:[%s5616_s3 + $0x78] sm:$0xf0]  ;;  %v3728_v0 = vld [vmem:[%s5616_s3 + $0x7c] sm:$0xf0]  ;;  %v2871_v6 = vld [vmem:[%s5616_s3 + $0x30] sm:$0xf] }
 0x1c2   :  { %3037 = vmatmul.msk.bf16.vlgmr.msra.gmra.mxu0 %vm489_vm8, %v1288_v50  ;;  %v3761_v50 = vld [vmem:[%s5616_s3 + $0x18c] sm:$0xf]  ;;  %v3721_v7 = vld [vmem:[%s5616_s3 + $0x44] sm:$0xf0]  ;;  %v3716_v21 = vld [vmem:[%s5616_s3 + $0x1c] sm:$0xf0] }
 0x1c3   :  { %945 = vmatpush.bf16.msra.mxu2 %v2796_v29  ;;  %1639 = vmatpush.bf16.msrb.mxu0 %v3173_v49  ;;  %v2668_v53 = vor.u32 %v3761_v50, %v2665_v51  ;;  %v3023_v29 = vld [vmem:[%s5616_s3 + $0x158] sm:$0xf]  ;;  %v2919_v50 = vld [vmem:[%s5616_s3 + $0x90] sm:$0xf]  ;;  %v3733_v51 = vld [vmem:[%s5616_s3 + $0xa4] sm:$0xf0] }
 0x1c4   :  { %920 = vmatpush.bf16.msrb.mxu3 %v2764_v12  ;;  %v3024_v16 = vor.u32 %v3758_v10, %v3023_v29  ;;  %v2873_v8 = vld [vmem:[%s5616_s3 + $0x48] sm:$0xf0]  ;;  %v2879_v29 = vld [vmem:[%s5616_s3 + $0x38] sm:$0xf]  ;;  %v3722_v10 = vld [vmem:[%s5616_s3 + $0x4c] sm:$0xf0] }
 0x1c5   :  { %934 = vmatpush.bf16.msrb.mxu1 %v2744_v23  ;;  %v3752_v23 = vld [vmem:[%s5616_s3 + $0x13c] sm:$0xf0]  ;;  %v3755_v20 = vld [vmem:[%s5616_s3 + $0x15c] sm:$0xf]  ;;  %v2953_v55 = vld [vmem:[%s5616_s3 + $0xe0] sm:$0xf0] }
 0x1c6   :  { %v3743_v45 = vld [vmem:[%s5616_s3 + $0xfc] sm:$0xf] }
 0x1c7   :  { %946 = vmatpush.bf16.msra.mxu2 %v2772_v19  ;;  %1640 = vmatpush.bf16.msrb.mxu0 %v3149_v61  ;;  %v3751_v19 = vld [vmem:[%s5616_s3 + $0x134] sm:$0xf0] }
 0x1c8   :  { %921 = vmatpush.bf16.msrb.mxu3 %v2740_v22  ;;  %v2999_v22 = vld [vmem:[%s5616_s3 + $0x128] sm:$0xf]  ;;  %v3727_v61 = vld [vmem:[%s5616_s3 + $0x74] sm:$0xf0] }
 0x1c9   :  { %935 = vmatpush.bf16.msrb.mxu1 %v2720_v35  ;;  %v3000_v27 = vor.u32 %v3752_v23, %v2999_v22  ;;  %v2975_v35 = vld [vmem:[%s5616_s3 + $0xf8] sm:$0xf]  ;;  %v2896_v1 = vor.u32 %v3727_v61, %v2895_v60  ;;  %v3025_v22 = vld [vmem:[%s5616_s3 + $0x170] sm:$0xf0]  ;;  %v3031_v23 = vld [vmem:[%s5616_s3 + $0x160] sm:$0xf] }
 0x1ca   :  { %v3028_v34 = vor.u32 %v3755_v20, %v3025_v22  ;;  %v3723_v20 = vld [vmem:[%s5616_s3 + $0x54] sm:$0xf0]  ;;  %v3720_v22 = vld [vmem:[%s5616_s3 + $0x44] sm:$0xf] }
 0x1cb   :  { %947 = vmatpush.bf16.msra.mxu2 %v2748_v24  ;;  %1641 = vmatpush.bf16.msrb.mxu0 %v3125_v63  ;;  %v2992_v24 = vor.u32 %v3751_v19, %v2991_v18  ;;  %v2903_v63 = vld [vmem:[%s5616_s3 + $0x68] sm:$0xf]  ;;  %v2849_v18 = vld [vmem:[%s5616_s3 + $0x18] sm:$0xf0] }
 0x1cc   :  { %922 = vmatpush.bf16.msrb.mxu3 %v2716_v30  ;;  %v3745_v30 = vld [vmem:[%s5616_s3 + $0x104] sm:$0xf0]  ;;  %v2904_v5 = vor.u32 %v3728_v0, %v2903_v63  ;;  %v2929_v63 = vld [vmem:[%s5616_s3 + $0xb0] sm:$0xf0]  ;;  %v2935_v0 = vld [vmem:[%s5616_s3 + $0xa0] sm:$0xf] }
 0x1cd   :  { %936 = vmatpush.bf16.msrb.mxu1 %v2696_v46  ;;  %v2968_v39 = vor.u32 %v3745_v30, %v2967_v28  ;;  %v2951_v46 = vld [vmem:[%s5616_s3 + $0xc8] sm:$0xf]  ;;  %v3033_v28 = vld [vmem:[%s5616_s3 + $0x178] sm:$0xf0] }
 0x1ce   :  { %v2855_v19 = vld [vmem:[%s5616_s3 + $0x8] sm:$0xf] }
 0x1cf   :  { %948 = vmatpush.bf16.msra.mxu2 %v2724_v36  ;;  %1642 = vmatpush.bf16.msrb.mxu0 %v3101_v3  ;;  %v3746_v36 = vld [vmem:[%s5616_s3 + $0x10c] sm:$0xf0]  ;;  %v2900_v3 = vor.u32 %v3724_v62, %v2897_v25  ;;  %v3731_v62 = vld [vmem:[%s5616_s3 + $0x9c] sm:$0xf] }
 0x1d0   :  { %923 = vmatpush.bf16.msrb.mxu3 %v2692_v42  ;;  %v2976_v40 = vor.u32 %v3746_v36, %v2975_v35  ;;  %v3739_v42 = vld [vmem:[%s5616_s3 + $0xd4] sm:$0xf0]  ;;  %v3749_v36 = vld [vmem:[%s5616_s3 + $0x12c] sm:$0xf] }
 0x1d1   :  { %937 = vmatpush.bf16.msrb.mxu1 %v2672_v57  ;;  %v2944_v17 = vor.u32 %v3739_v42, %v2943_v41  ;;  %v2920_v57 = vor.u32 %v3733_v51, %v2919_v50  ;;  %v2985_v50 = vld [vmem:[%s5616_s3 + $0x118] sm:$0xf0] }
 0x1d3   :  { %949 = vmatpush.bf16.msra.mxu2 %v2700_v47  ;;  %v3740_v47 = vld [vmem:[%s5616_s3 + $0xdc] sm:$0xf0] }
 0x1d4   :  { %924 = vmatpush.bf16.msrb.mxu3 %v2668_v53  ;;  %v2952_v49 = vor.u32 %v3740_v47, %v2951_v46  ;;  %v2921_v53 = vld [vmem:[%s5616_s3 + $0xa8] sm:$0xf0]  ;;  %v2977_v47 = vld [vmem:[%s5616_s3 + $0x110] sm:$0xf0] }
 0x1d5   :  { %v2980_v51 = vor.u32 %v3743_v45, %v2977_v47 }
 0x1d7   :  { %950 = vmatpush.bf16.msra.mxu2 %v2676_v58  ;;  %v2924_v58 = vor.u32 %v3730_v52, %v2921_v53  ;;  %v3737_v53 = vld [vmem:[%s5616_s3 + $0xcc] sm:$0xf] }
 0x1d8   :  { %v2956_v60 = vor.u32 %v3737_v53, %v2953_v55 }
 0x22f   :  { %v4569_v4 = vpop.f32.mrf.mxu0 }
 0x230   :  { %v506_v30 = vmax.f32 %v4569_v4, 0.0  ;;  %v3753_v4 = vld [vmem:[%s5616_s3 + $0x144] sm:$0xf0] }
 0x232   :  { %v4763_v41 = vpack.c.bf16 %v506_v30, %v506_v30  ;;  %v2863_v30 = vld [vmem:[%s5616_s3 + $0x10] sm:$0xf] }
 0x235   :  { %v583_v31 = vpop.f32.mrf.mxu2 }
 0x236   :  { %v587_v11 = vmax.f32 %v583_v31, 0.0  ;;  %v3718_v31 = vld [vmem:[%s5616_s3 + $0x34] sm:$0xf] }
 0x237   :  { %v504_v12 = vpop.f32.mrf.mxu0 }
 0x238   :  { %v4589_v14 = vpack.c.bf16 %v587_v11, %v587_v11  ;;  %v2872_v11 = vor.u32 %v3721_v7, %v2871_v6  ;;  %v2847_v12 = vld [vmem:[%s5616_s3] sm:$0xf]  ;;  %v2932_v6 = vor.u32 %v3731_v62, %v2929_v63 }
 0x23a   :  { %886 = vmatmul.bf16.vlgmr.msra.gmra.mxu3 %v4589_v14  ;;  %899 = vmatmul.bf16.vlgmr.msra.gmra.mxu1 %v4589_v14 }
 0x23b   :  { %912 = vmatmul.bf16.vlgmr.msrb.gmra.mxu2 %v4589_v14  ;;  %1196 = vmatpush.bf16.msra.mxu3 %v3016_v13  ;;  %v2876_v13 = vor.u32 %v3718_v31, %v2873_v8  ;;  %v3725_v31 = vld [vmem:[%s5616_s3 + $0x6c] sm:$0xf] }
 0x23c   :  { %1209 = vmatpush.bf16.msra.mxu1 %v3020_v15  ;;  %1222 = vmatpush.bf16.msrb.mxu2 %v3024_v16  ;;  %v3715_v15 = vld [vmem:[%s5616_s3 + $0x14] sm:$0xf0]  ;;  %v3712_v16 = vld [vmem:[%s5616_s3 + $0x4] sm:$0xf] }
 0x23d   :  { %v585_v33 = vpop.f32.mrf.mxu2  ;;  %v2852_v32 = vor.u32 %v3712_v16, %v2849_v18  ;;  %v3719_v16 = vld [vmem:[%s5616_s3 + $0x3c] sm:$0xf] }
 0x23e   :  { %v2856_v33 = vor.u32 %v3716_v21, %v2855_v19  ;;  %v2881_v19 = vld [vmem:[%s5616_s3 + $0x50] sm:$0xf0]  ;;  %v2887_v21 = vld [vmem:[%s5616_s3 + $0x40] sm:$0xf] }
 0x23f   :  { %v1301_v37 = vpop.f32.mrf.mxu0  ;;  %1197 = vmatpush.bf16.msra.mxu3 %v2992_v24  ;;  %v3759_v24 = vld [vmem:[%s5616_s3 + $0x174] sm:$0xf0] }
 0x240   :  { %v1305_v38 = vmax.f32 %v1301_v37, 0.0  ;;  %1210 = vmatpush.bf16.msra.mxu1 %v2996_v26  ;;  %1223 = vmatpush.bf16.msrb.mxu2 %v3000_v27  ;;  %v2848_v26 = vor.u32 %v3715_v15, %v2847_v12  ;;  %v3756_v27 = vld [vmem:[%s5616_s3 + $0x164] sm:$0xf]  ;;  %v3032_v35 = vor.u32 %v3759_v24, %v3031_v23  ;;  %v3726_v12 = vld [vmem:[%s5616_s3 + $0x74] sm:$0xf]  ;;  %v2884_v24 = vor.u32 %v3719_v16, %v2881_v19 }
 0x241   :  { %v3036_v37 = vor.u32 %v3756_v27, %v3033_v28  ;;  %v2889_v23 = vld [vmem:[%s5616_s3 + $0x58] sm:$0xf0]  ;;  %v3713_v27 = vld [vmem:[%s5616_s3 + $0xc] sm:$0xf]  ;;  %v2857_v28 = vld [vmem:[%s5616_s3 + $0x20] sm:$0xf0] }
 0x242   :  { %v4639_v44 = vpack.c.bf16 %v1305_v38, %v1305_v38  ;;  %v3001_v38 = vld [vmem:[%s5616_s3 + $0x140] sm:$0xf0]  ;;  %v3136_v19 = vld [vmem:[%s5616_s3 + $0x360] sm:$0xf] }
 0x243   :  { %1198 = vmatpush.bf16.msra.mxu3 %v2968_v39  ;;  %v3007_v39 = vld [vmem:[%s5616_s3 + $0x130] sm:$0xf]  ;;  %v3004_v42 = vor.u32 %v3749_v36, %v3001_v38  ;;  %v3850_v38 = vld [vmem:[%s5616_s3 + $0x454] sm:$0xf] }
 0x244   :  { %1643 = vmatmul.bf16.vlgmr.msrb.gmra.mxu0 %v4639_v44  ;;  %1211 = vmatpush.bf16.msra.mxu1 %v2972_v9  ;;  %v3750_v9 = vld [vmem:[%s5616_s3 + $0x134] sm:$0xf]  ;;  %v3008_v43 = vor.u32 %v3753_v4, %v3007_v39  ;;  %v3256_v36 = vld [vmem:[%s5616_s3 + $0x450] sm:$0xf]  ;;  %v3258_v39 = vld [vmem:[%s5616_s3 + $0x468] sm:$0xf0] }
 0x245   :  { %1224 = vmatpush.bf16.msrb.mxu2 %v2976_v40  ;;  %v3009_v40 = vld [vmem:[%s5616_s3 + $0x148] sm:$0xf0]  ;;  %v3264_v4 = vld [vmem:[%s5616_s3 + $0x458] sm:$0xf] }
 0x246   :  { %v3012_v46 = vor.u32 %v3750_v9, %v3009_v40  ;;  %v3854_v9 = vld [vmem:[%s5616_s3 + $0x46c] sm:$0xf0]  ;;  %v2860_v40 = vor.u32 %v3713_v27, %v2857_v28 }
 0x247   :  { %v1303_v56 = vpop.f32.mrf.mxu0  ;;  %1199 = vmatpush.bf16.msra.mxu3 %v2944_v17  ;;  %v2983_v17 = vld [vmem:[%s5616_s3 + $0x100] sm:$0xf]  ;;  %v3265_v47 = vor.u32 %v3854_v9, %v3264_v4  ;;  %v3811_v9 = vld [vmem:[%s5616_s3 + $0x314] sm:$0xf0] }
 0x248   :  { %1212 = vmatpush.bf16.msra.mxu1 %v2948_v48  ;;  %v3747_v48 = vld [vmem:[%s5616_s3 + $0x114] sm:$0xf0]  ;;  %v2959_v56 = vld [vmem:[%s5616_s3 + $0xd0] sm:$0xf] }
 0x249   :  { %1225 = vmatpush.bf16.msrb.mxu2 %v2952_v49  ;;  %v3744_v49 = vld [vmem:[%s5616_s3 + $0x104] sm:$0xf]  ;;  %v2984_v52 = vor.u32 %v3747_v48, %v2983_v17  ;;  %v3232_v17 = vld [vmem:[%s5616_s3 + $0x420] sm:$0xf]  ;;  %v3847_v48 = vld [vmem:[%s5616_s3 + $0x434] sm:$0xf0] }
 0x24a   :  { %925 = vmatmul.bf16.vlgmr.msrb.gmra.mxu3 %v4589_v14  ;;  %938 = vmatmul.bf16.vlgmr.msrb.gmra.mxu1 %v4589_v14  ;;  %v2988_v54 = vor.u32 %v3744_v49, %v2985_v50  ;;  %v3844_v49 = vld [vmem:[%s5616_s3 + $0x424] sm:$0xf]  ;;  %v3234_v50 = vld [vmem:[%s5616_s3 + $0x438] sm:$0xf0]  ;;  %v3233_v53 = vor.u32 %v3847_v48, %v3232_v17 }
 0x24b   :  { %951 = vmatmul.bf16.vlgmr.msra.gmra.mxu2 %v4589_v14  ;;  %1200 = vmatpush.bf16.msra.mxu3 %v2920_v57  ;;  %v2880_v14 = vor.u32 %v3722_v10, %v2879_v29  ;;  %v3741_v57 = vld [vmem:[%s5616_s3 + $0xe4] sm:$0xf0]  ;;  %v2905_v29 = vld [vmem:[%s5616_s3 + $0x80] sm:$0xf0]  ;;  %v2911_v10 = vld [vmem:[%s5616_s3 + $0x70] sm:$0xf] }
 0x24c   :  { %1213 = vmatpush.bf16.msra.mxu1 %v2924_v58  ;;  %v3738_v58 = vld [vmem:[%s5616_s3 + $0xd4] sm:$0xf]  ;;  %v2960_v61 = vor.u32 %v3741_v57, %v2959_v56  ;;  %v3208_v56 = vld [vmem:[%s5616_s3 + $0x3f0] sm:$0xf]  ;;  %v3841_v57 = vld [vmem:[%s5616_s3 + $0x404] sm:$0xf0] }
 0x24d   :  { %1226 = vmatpush.bf16.msrb.mxu2 %v2928_v59  ;;  %v2961_v59 = vld [vmem:[%s5616_s3 + $0xe8] sm:$0xf0]  ;;  %v3209_v62 = vor.u32 %v3841_v57, %v3208_v56  ;;  %v3852_v17 = vld [vmem:[%s5616_s3 + $0x464] sm:$0xf]  ;;  %v3274_v48 = vld [vmem:[%s5616_s3 + $0x478] sm:$0xf0] }
 0x24e   :  { %v2964_v25 = vor.u32 %v3738_v58, %v2961_v59  ;;  %v3838_v58 = vld [vmem:[%s5616_s3 + $0x3f4] sm:$0xf]  ;;  %v3210_v59 = vld [vmem:[%s5616_s3 + $0x408] sm:$0xf0] }
 0x24f   :  { %1201 = vmatpush.bf16.msra.mxu3 %v2896_v1  ;;  %v3735_v1 = vld [vmem:[%s5616_s3 + $0xb4] sm:$0xf0]  ;;  %v3846_v56 = vld [vmem:[%s5616_s3 + $0x434] sm:$0xf]  ;;  %v3250_v57 = vld [vmem:[%s5616_s3 + $0x448] sm:$0xf0] }
 0x250   :  { %1214 = vmatpush.bf16.msra.mxu1 %v2900_v3  ;;  %v3732_v3 = vld [vmem:[%s5616_s3 + $0xa4] sm:$0xf]  ;;  %v2936_v7 = vor.u32 %v3735_v1, %v2935_v0  ;;  %v3184_v0 = vld [vmem:[%s5616_s3 + $0x3c0] sm:$0xf]  ;;  %v3835_v1 = vld [vmem:[%s5616_s3 + $0x3d4] sm:$0xf0] }
 0x251   :  { %1227 = vmatpush.bf16.msrb.mxu2 %v2904_v5  ;;  %v2937_v5 = vld [vmem:[%s5616_s3 + $0xb8] sm:$0xf0] }
 0x252   :  { %v2940_v8 = vor.u32 %v3732_v3, %v2937_v5  ;;  %v3832_v3 = vld [vmem:[%s5616_s3 + $0x3c4] sm:$0xf]  ;;  %v3192_v5 = vld [vmem:[%s5616_s3 + $0x3c8] sm:$0xf] }
 0x253   :  { %1202 = vmatpush.bf16.msra.mxu3 %v2872_v11  ;;  %v3729_v11 = vld [vmem:[%s5616_s3 + $0x84] sm:$0xf0] }
 0x254   :  { %1215 = vmatpush.bf16.msra.mxu1 %v2876_v13  ;;  %v2913_v13 = vld [vmem:[%s5616_s3 + $0x88] sm:$0xf0]  ;;  %v2912_v15 = vor.u32 %v3729_v11, %v2911_v10  ;;  %v3829_v10 = vld [vmem:[%s5616_s3 + $0x3a4] sm:$0xf0]  ;;  %v3826_v11 = vld [vmem:[%s5616_s3 + $0x394] sm:$0xf] }
 0x255   :  { %1228 = vmatpush.bf16.msrb.mxu2 %v2880_v14  ;;  %v2908_v14 = vor.u32 %v3725_v31, %v2905_v29  ;;  %v2916_v18 = vor.u32 %v3726_v12, %v2913_v13  ;;  %v3160_v29 = vld [vmem:[%s5616_s3 + $0x390] sm:$0xf]  ;;  %v3162_v12 = vld [vmem:[%s5616_s3 + $0x3a8] sm:$0xf0]  ;;  %v3168_v13 = vld [vmem:[%s5616_s3 + $0x398] sm:$0xf] }
 0x256   :  { %v3165_v16 = vor.u32 %v3826_v11, %v3162_v12  ;;  %v3178_v11 = vld [vmem:[%s5616_s3 + $0x3b8] sm:$0xf0] }
 0x257   :  { %1203 = vmatpush.bf16.msra.mxu3 %v2848_v26  ;;  %v2888_v26 = vor.u32 %v3723_v20, %v2887_v21  ;;  %v3823_v21 = vld [vmem:[%s5616_s3 + $0x374] sm:$0xf0]  ;;  %v3820_v20 = vld [vmem:[%s5616_s3 + $0x364] sm:$0xf] }
 0x258   :  { %1216 = vmatpush.bf16.msra.mxu1 %v2852_v32  ;;  %v2892_v32 = vor.u32 %v3720_v22, %v2889_v23  ;;  %v3138_v22 = vld [vmem:[%s5616_s3 + $0x378] sm:$0xf0]  ;;  %v3144_v23 = vld [vmem:[%s5616_s3 + $0x368] sm:$0xf] }
 0x259   :  { %1229 = vmatpush.bf16.msrb.mxu2 %v2856_v33  ;;  %v3717_v33 = vld [vmem:[%s5616_s3 + $0x24] sm:$0xf0]  ;;  %v3141_v27 = vor.u32 %v3820_v20, %v3138_v22  ;;  %v3128_v22 = vld [vmem:[%s5616_s3 + $0x340] sm:$0xf] }
 0x25a   :  { %1204 = vmatmul.bf16.vlgmr.msra.gmra.mxu3 %v4763_v41 }
 0x25b   :  { %1235 = vmatpush.bf16.msrb.mxu3 %v3028_v34  ;;  %1217 = vmatmul.bf16.vlgmr.msra.gmra.mxu1 %v4763_v41  ;;  %v3714_v34 = vld [vmem:[%s5616_s3 + $0x14] sm:$0xf] }
 0x25c   :  { %1248 = vmatpush.bf16.msrb.mxu1 %v3032_v35  ;;  %1230 = vmatmul.bf16.vlgmr.msrb.gmra.mxu2 %v4763_v41  ;;  %v2865_v35 = vld [vmem:[%s5616_s3 + $0x28] sm:$0xf0] }
 0x25d   :  { %1261 = vmatpush.bf16.msra.mxu2 %v3036_v37  ;;  %v3853_v37 = vld [vmem:[%s5616_s3 + $0x464] sm:$0xf0] }
 0x25e   :  { %v3257_v45 = vor.u32 %v3853_v37, %v3256_v36  ;;  %v3818_v36 = vld [vmem:[%s5616_s3 + $0x34c] sm:$0xf0] }
 0x25f   :  { %1236 = vmatpush.bf16.msrb.mxu3 %v3004_v42  ;;  %v2864_v42 = vor.u32 %v3717_v33, %v2863_v30  ;;  %v3112_v30 = vld [vmem:[%s5616_s3 + $0x330] sm:$0xf]  ;;  %v3814_v33 = vld [vmem:[%s5616_s3 + $0x334] sm:$0xf] }
 0x260   :  { %1249 = vmatpush.bf16.msrb.mxu1 %v3008_v43  ;;  %v2868_v43 = vor.u32 %v3714_v34, %v2865_v35  ;;  %v3114_v34 = vld [vmem:[%s5616_s3 + $0x348] sm:$0xf0]  ;;  %v3120_v35 = vld [vmem:[%s5616_s3 + $0x338] sm:$0xf] }
 0x261   :  { %1262 = vmatpush.bf16.msra.mxu2 %v3012_v46  ;;  %v3261_v46 = vor.u32 %v3850_v38, %v3258_v39  ;;  %v3088_v38 = vld [vmem:[%s5616_s3 + $0x300] sm:$0xf]  ;;  %v3117_v39 = vor.u32 %v3814_v33, %v3114_v34  ;;  %v3121_v4 = vor.u32 %v3818_v36, %v3120_v35  ;;  %v3106_v33 = vld [vmem:[%s5616_s3 + $0x328] sm:$0xf0] }
 0x263   :  { %1237 = vmatpush.bf16.msrb.mxu3 %v2980_v51  ;;  %v3240_v51 = vld [vmem:[%s5616_s3 + $0x428] sm:$0xf] }
 0x264   :  { %1250 = vmatpush.bf16.msrb.mxu1 %v2984_v52  ;;  %v3848_v52 = vld [vmem:[%s5616_s3 + $0x43c] sm:$0xf0] }
 0x265   :  { %1263 = vmatpush.bf16.msra.mxu2 %v2988_v54  ;;  %v3237_v54 = vor.u32 %v3844_v49, %v3234_v50  ;;  %v3241_v55 = vor.u32 %v3848_v52, %v3240_v51  ;;  %v3089_v49 = vor.u32 %v3811_v9, %v3088_v38 }
 0x267   :  { %1238 = vmatpush.bf16.msrb.mxu3 %v2956_v60  ;;  %v3216_v60 = vld [vmem:[%s5616_s3 + $0x3f8] sm:$0xf] }
 0x268   :  { %1251 = vmatpush.bf16.msrb.mxu1 %v2960_v61  ;;  %v3842_v61 = vld [vmem:[%s5616_s3 + $0x40c] sm:$0xf0] }
 0x269   :  { %1264 = vmatpush.bf16.msra.mxu2 %v2964_v25  ;;  %v3213_v25 = vor.u32 %v3838_v58, %v3210_v59  ;;  %v3217_v63 = vor.u32 %v3842_v61, %v3216_v60  ;;  %v3253_v59 = vor.u32 %v3846_v56, %v3250_v57  ;;  %v3224_v60 = vld [vmem:[%s5616_s3 + $0x400] sm:$0xf]  ;;  %v3499_v57 = vld [vmem:[%s5616_s3 + $0x5e8] sm:$0xf0] }
 0x26a   :  { %v3993_v61 = vld [vmem:[%s5615_s2] sm:$0xff] }
 0x26b   :  { %1239 = vmatpush.bf16.msrb.mxu3 %v2932_v6  ;;  %v3836_v6 = vld [vmem:[%s5616_s3 + $0x3dc] sm:$0xf0] }
 0x26c   :  { %1252 = vmatpush.bf16.msrb.mxu1 %v2936_v7  ;;  %v3185_v7 = vor.u32 %v3835_v1, %v3184_v0 }
 0x26d   :  { %1265 = vmatpush.bf16.msra.mxu2 %v2940_v8  ;;  %v3193_v8 = vor.u32 %v3836_v6, %v3192_v5  ;;  %v3834_v5 = vld [vmem:[%s5616_s3 + $0x3d4] sm:$0xf]  ;;  %v3202_v6 = vld [vmem:[%s5616_s3 + $0x3e8] sm:$0xf0] }
 0x26f   :  { %1240 = vmatpush.bf16.msrb.mxu3 %v2908_v14  ;;  %v3830_v14 = vld [vmem:[%s5616_s3 + $0x3ac] sm:$0xf0] }
 0x270   :  { %1253 = vmatpush.bf16.msrb.mxu1 %v2912_v15  ;;  %v3161_v15 = vor.u32 %v3829_v10, %v3160_v29  ;;  %v3831_v29 = vld [vmem:[%s5616_s3 + $0x3b4] sm:$0xf0]  ;;  %v3828_v10 = vld [vmem:[%s5616_s3 + $0x3a4] sm:$0xf] }
 0x271   :  { %1266 = vmatpush.bf16.msra.mxu2 %v2916_v18  ;;  %v3169_v18 = vor.u32 %v3830_v14, %v3168_v13  ;;  %v3181_v13 = vor.u32 %v3828_v10, %v3178_v11  ;;  %v3152_v14 = vld [vmem:[%s5616_s3 + $0x370] sm:$0xf]  ;;  %v3883_v10 = vld [vmem:[%s5616_s3 + $0x554] sm:$0xf0] }
 0x273   :  { %1241 = vmatpush.bf16.msrb.mxu3 %v2884_v24  ;;  %v3824_v24 = vld [vmem:[%s5616_s3 + $0x37c] sm:$0xf0] }
 0x274   :  { %1254 = vmatpush.bf16.msrb.mxu1 %v2888_v26  ;;  %v3137_v26 = vor.u32 %v3823_v21, %v3136_v19  ;;  %v3145_v28 = vor.u32 %v3824_v24, %v3144_v23  ;;  %v1694_v19 = vpack.c.b16 %v4325_v2, %v4325_v2  ;;  %v3819_v23 = vld [vmem:[%s5616_s3 + $0x354] sm:$0xf0]  ;;  %v3816_v24 = vld [vmem:[%s5616_s3 + $0x344] sm:$0xf] }
 0x275   :  { %1267 = vmatpush.bf16.msra.mxu2 %v2892_v32  ;;  %v3817_v32 = vld [vmem:[%s5616_s3 + $0x344] sm:$0xf0]  ;;  %v3129_v2 = vor.u32 %v3819_v23, %v3128_v22  ;;  %v3401_v23 = vld [vmem:[%s5616_s3 + $0x510] sm:$0xf] }
 0x276   :  { %v3113_v37 = vor.u32 %v3817_v32, %v3112_v30  ;;  %v3813_v30 = vld [vmem:[%s5616_s3 + $0x324] sm:$0xf0]  ;;  %v3810_v32 = vld [vmem:[%s5616_s3 + $0x314] sm:$0xf] }
 0x277   :  { %1242 = vmatpush.bf16.msrb.mxu3 %v2860_v40  ;;  %v3808_v40 = vld [vmem:[%s5616_s3 + $0x304] sm:$0xf]  ;;  %v3109_v35 = vor.u32 %v3810_v32, %v3106_v33  ;;  %v3896_v32 = vld [vmem:[%s5616_s3 + $0x5bc] sm:$0xf0]  ;;  %v3893_v33 = vld [vmem:[%s5616_s3 + $0x5ac] sm:$0xf] }
 0x278   :  { %1255 = vmatpush.bf16.msrb.mxu1 %v2864_v42  ;;  %v3090_v42 = vld [vmem:[%s5616_s3 + $0x318] sm:$0xf0] }
 0x279   :  { %1268 = vmatpush.bf16.msra.mxu2 %v2868_v43  ;;  %v3096_v43 = vld [vmem:[%s5616_s3 + $0x308] sm:$0xf]  ;;  %v3093_v50 = vor.u32 %v3808_v40, %v3090_v42 }
 0x27a   :  { %1243 = vmatmul.bf16.vlgmr.msrb.gmra.mxu3 %v4763_v41 }
 0x27b   :  { %1596 = vmatpush.bf16.msra.mxu3 %v3257_v45  ;;  %1256 = vmatmul.bf16.vlgmr.msrb.gmra.mxu1 %v4763_v41  ;;  %v3812_v45 = vld [vmem:[%s5616_s3 + $0x31c] sm:$0xf0] }
 0x27c   :  { %1609 = vmatpush.bf16.msra.mxu1 %v3261_v46  ;;  %1269 = vmatmul.bf16.vlgmr.msra.gmra.mxu2 %v4763_v41  ;;  %v3186_v41 = vld [vmem:[%s5616_s3 + $0x3d8] sm:$0xf0]  ;;  %v3272_v46 = vld [vmem:[%s5616_s3 + $0x460] sm:$0xf]  ;;  %v3097_v51 = vor.u32 %v3812_v45, %v3096_v43 }
 0x27d   :  { %1622 = vmatpush.bf16.msrb.mxu2 %v3265_v47  ;;  %v3189_v31 = vor.u32 %v3832_v3, %v3186_v41  ;;  %v3855_v47 = vld [vmem:[%s5616_s3 + $0x474] sm:$0xf0]  ;;  %v3200_v3 = vld [vmem:[%s5616_s3 + $0x3d0] sm:$0xf]  ;;  %v3837_v41 = vld [vmem:[%s5616_s3 + $0x3e4] sm:$0xf0] }
 0x27e   :  { %v3273_v52 = vor.u32 %v3855_v47, %v3272_v46 }
 0x27f   :  { %1597 = vmatpush.bf16.msra.mxu3 %v3233_v53  ;;  %v3277_v53 = vor.u32 %v3852_v17, %v3274_v48 }
 0x280   :  { %1610 = vmatpush.bf16.msra.mxu1 %v3237_v54  ;;  %v3248_v54 = vld [vmem:[%s5616_s3 + $0x430] sm:$0xf] }
 0x281   :  { %1623 = vmatpush.bf16.msrb.mxu2 %v3241_v55  ;;  %v3849_v55 = vld [vmem:[%s5616_s3 + $0x444] sm:$0xf0] }
 0x282   :  { %v3249_v58 = vor.u32 %v3849_v55, %v3248_v54 }
 0x283   :  { %1598 = vmatpush.bf16.msra.mxu3 %v3209_v62  ;;  %v3843_v62 = vld [vmem:[%s5616_s3 + $0x414] sm:$0xf0] }
 0x284   :  { %1611 = vmatpush.bf16.msra.mxu1 %v3213_v25  ;;  %v3840_v25 = vld [vmem:[%s5616_s3 + $0x404] sm:$0xf]  ;;  %v3225_v0 = vor.u32 %v3843_v62, %v3224_v60  ;;  %v3895_v62 = vld [vmem:[%s5616_s3 + $0x5b4] sm:$0xf0] }
 0x285   :  { %1624 = vmatpush.bf16.msrb.mxu2 %v3217_v63  ;;  %v3226_v63 = vld [vmem:[%s5616_s3 + $0x418] sm:$0xf0] }
 0x286   :  { %v3229_v1 = vor.u32 %v3840_v25, %v3226_v63  ;;  %v3892_v25 = vld [vmem:[%s5616_s3 + $0x5a4] sm:$0xf] }
 0x287   :  { %1599 = vmatpush.bf16.msra.mxu3 %v3185_v7  ;;  %v3201_v7 = vor.u32 %v3837_v41, %v3200_v3  ;;  %v3449_v3 = vld [vmem:[%s5616_s3 + $0x570] sm:$0xf]  ;;  %v3889_v41 = vld [vmem:[%s5616_s3 + $0x584] sm:$0xf0] }
 0x288   :  { %1612 = vmatpush.bf16.msra.mxu1 %v3189_v31  ;;  %v3205_v31 = vor.u32 %v3834_v5, %v3202_v6 }
 0x289   :  { %1625 = vmatpush.bf16.msrb.mxu2 %v3193_v8  ;;  %v3176_v8 = vld [vmem:[%s5616_s3 + $0x3a0] sm:$0xf] }
 0x28a   :  { %v3177_v12 = vor.u32 %v3831_v29, %v3176_v8  ;;  %v3450_v8 = vor.u32 %v3889_v41, %v3449_v3  ;;  %v3425_v29 = vld [vmem:[%s5616_s3 + $0x540] sm:$0xf] }
 0x28b   :  { %1600 = vmatpush.bf16.msra.mxu3 %v3161_v15  ;;  %v3825_v15 = vld [vmem:[%s5616_s3 + $0x384] sm:$0xf0]  ;;  %v3329_v41 = vld [vmem:[%s5616_s3 + $0x480] sm:$0xf] }
 0x28c   :  { %1613 = vmatpush.bf16.msra.mxu1 %v3165_v16  ;;  %v3822_v16 = vld [vmem:[%s5616_s3 + $0x374] sm:$0xf]  ;;  %v3153_v21 = vor.u32 %v3825_v15, %v3152_v14  ;;  %v3899_v14 = vld [vmem:[%s5616_s3 + $0x5dc] sm:$0xf]  ;;  %v3880_v15 = vld [vmem:[%s5616_s3 + $0x544] sm:$0xf] }
 0x28d   :  { %1626 = vmatpush.bf16.msrb.mxu2 %v3169_v18  ;;  %v3154_v18 = vld [vmem:[%s5616_s3 + $0x388] sm:$0xf0] }
 0x28e   :  { %v3157_v20 = vor.u32 %v3822_v16, %v3154_v18  ;;  %v3427_v16 = vld [vmem:[%s5616_s3 + $0x558] sm:$0xf0] }
 0x28f   :  { %1601 = vmatpush.bf16.msra.mxu3 %v3137_v26  ;;  %v3130_v26 = vld [vmem:[%s5616_s3 + $0x358] sm:$0xf0]  ;;  %v3430_v22 = vor.u32 %v3880_v15, %v3427_v16  ;;  %v3411_v16 = vld [vmem:[%s5616_s3 + $0x530] sm:$0xf0] }
 0x290   :  { %1614 = vmatpush.bf16.msra.mxu1 %v3141_v27  ;;  %v3133_v27 = vor.u32 %v3816_v24, %v3130_v26  ;;  %v3877_v24 = vld [vmem:[%s5616_s3 + $0x524] sm:$0xf0]  ;;  %v3874_v26 = vld [vmem:[%s5616_s3 + $0x514] sm:$0xf]  ;;  %v3875_v15 = vld [vmem:[%s5616_s3 + $0x51c] sm:$0xf] }
 0x291   :  { %1627 = vmatpush.bf16.msrb.mxu2 %v3145_v28  ;;  %v3104_v28 = vld [vmem:[%s5616_s3 + $0x310] sm:$0xf] }
 0x292   :  { %v3105_v34 = vor.u32 %v3813_v30, %v3104_v28  ;;  %v3481_v30 = vld [vmem:[%s5616_s3 + $0x5a8] sm:$0xf] }
 0x293   :  { %1602 = vmatpush.bf16.msra.mxu3 %v3113_v37 }
 0x294   :  { %1615 = vmatpush.bf16.msra.mxu1 %v3117_v39 }
 0x295   :  { %1628 = vmatpush.bf16.msrb.mxu2 %v3121_v4 }
 0x297   :  { %1603 = vmatpush.bf16.msra.mxu3 %v3089_v49 }
 0x298   :  { %1616 = vmatpush.bf16.msra.mxu1 %v3093_v50 }
 0x299   :  { %1629 = vmatpush.bf16.msrb.mxu2 %v3097_v51  ;;  %v3497_v51 = vld [vmem:[%s5616_s3 + $0x5d0] sm:$0xf] }
 0x29a   :  { %1604 = vmatmul.bf16.vlgmr.msra.gmra.mxu3 %v4639_v44 }
 0x29b   :  { %1648 = vmatpush.bf16.msrb.mxu3 %v3273_v52  ;;  %1617 = vmatmul.bf16.vlgmr.msra.gmra.mxu1 %v4639_v44  ;;  %v3901_v52 = vld [vmem:[%s5616_s3 + $0x5e4] sm:$0xf0] }
 0x29c   :  { %1661 = vmatpush.bf16.msrb.mxu1 %v3277_v53  ;;  %1630 = vmatmul.bf16.vlgmr.msrb.gmra.mxu2 %v4639_v44  ;;  %v3898_v53 = vld [vmem:[%s5616_s3 + $0x5d4] sm:$0xf]  ;;  %v3498_v56 = vor.u32 %v3901_v52, %v3497_v51  ;;  %v3887_v51 = vld [vmem:[%s5616_s3 + $0x57c] sm:$0xf] }
 0x29d   :  { %1705 = vmatpush.bf16.msra.mxu2 %v3993_v61  ;;  %v3473_v61 = vld [vmem:[%s5616_s3 + $0x5a0] sm:$0xf]  ;;  %v3459_v52 = vld [vmem:[%s5616_s3 + $0x590] sm:$0xf0] }
 0x29e   :  { %2002 = vmatpush.bf16.msra.mxu0 %v3498_v56  ;;  %v3862_v56 = vld [vmem:[%s5616_s3 + $0x4b4] sm:$0xf] }
 0x29f   :  { %1649 = vmatpush.bf16.msrb.mxu3 %v3249_v58 }
 0x2a0   :  { %1662 = vmatpush.bf16.msrb.mxu1 %v3253_v59  ;;  %v3502_v59 = vor.u32 %v3898_v53, %v3499_v57  ;;  %v3462_v53 = vor.u32 %v3887_v51, %v3459_v52  ;;  %v3891_v51 = vld [vmem:[%s5616_s3 + $0x594] sm:$0xf0]  ;;  %v3888_v52 = vld [vmem:[%s5616_s3 + $0x584] sm:$0xf] }
 0x2a2   :  { %2015 = vmatpush.bf16.msrb.mxu2 %v3502_v59  ;;  %v3355_v59 = vld [vmem:[%s5616_s3 + $0x4c8] sm:$0xf0] }
 0x2a3   :  { %1650 = vmatpush.bf16.msrb.mxu3 %v3225_v0  ;;  %v3474_v0 = vor.u32 %v3895_v62, %v3473_v61  ;;  %v3884_v61 = vld [vmem:[%s5616_s3 + $0x55c] sm:$0xf0]  ;;  %v3358_v62 = vor.u32 %v3862_v56, %v3355_v59  ;;  %v3337_v56 = vld [vmem:[%s5616_s3 + $0x488] sm:$0xf]  ;;  %v3857_v59 = vld [vmem:[%s5616_s3 + $0x48c] sm:$0xf] }
 0x2a4   :  { %1663 = vmatpush.bf16.msrb.mxu1 %v3229_v1  ;;  %v3475_v1 = vld [vmem:[%s5616_s3 + $0x5b8] sm:$0xf0] }
 0x2a5   :  { %v3478_v6 = vor.u32 %v3892_v25, %v3475_v1  ;;  %2003 = vmatpush.bf16.msra.mxu0 %v3474_v0  ;;  %v3435_v0 = vld [vmem:[%s5616_s3 + $0x560] sm:$0xf0] }
 0x2a7   :  { %1651 = vmatpush.bf16.msrb.mxu3 %v3201_v7  ;;  %v3886_v7 = vld [vmem:[%s5616_s3 + $0x574] sm:$0xf]  ;;  %2016 = vmatpush.bf16.msrb.mxu2 %v3478_v6  ;;  %v3856_v6 = vld [vmem:[%s5616_s3 + $0x484] sm:$0xf] }
 0x2a8   :  { %1664 = vmatpush.bf16.msrb.mxu1 %v3205_v31  ;;  %v3451_v31 = vld [vmem:[%s5616_s3 + $0x588] sm:$0xf0] }
 0x2a9   :  { %v3454_v11 = vor.u32 %v3886_v7, %v3451_v31  ;;  %2004 = vmatpush.bf16.msra.mxu0 %v3450_v8 }
 0x2ab   :  { %1652 = vmatpush.bf16.msrb.mxu3 %v3177_v12  ;;  %v3505_v12 = vld [vmem:[%s5616_s3 + $0x5d8] sm:$0xf]  ;;  %2017 = vmatpush.bf16.msrb.mxu2 %v3454_v11  ;;  %v3878_v11 = vld [vmem:[%s5616_s3 + $0x52c] sm:$0xf0] }
 0x2ac   :  { %1665 = vmatpush.bf16.msrb.mxu1 %v3181_v13  ;;  %3278 = vmatmul.msk.bf16.vlgmr.msra.gmra.mxu2 %vm489_vm8, %v1694_v19  ;;  %v3902_v13 = vld [vmem:[%s5616_s3 + $0x5ec] sm:$0xf0]  ;;  %v3507_v19 = vld [vmem:[%s5616_s3 + $0x5f0] sm:$0xf0] }
 0x2ad   :  { %v3506_v18 = vor.u32 %v3902_v13, %v3505_v12 }
 0x2af   :  { %1653 = vmatpush.bf16.msrb.mxu3 %v3153_v21  ;;  %v3510_v21 = vor.u32 %v3899_v14, %v3507_v19  ;;  %2018 = vmatpush.bf16.msrb.mxu2 %v3430_v22  ;;  %v3414_v19 = vor.u32 %v3875_v15, %v3411_v16 }
 0x2b0   :  { %1666 = vmatpush.bf16.msrb.mxu1 %v3157_v20  ;;  %v3426_v20 = vor.u32 %v3883_v10, %v3425_v29  ;;  %v3331_v29 = vld [vmem:[%s5616_s3 + $0x498] sm:$0xf0]  ;;  %v3409_v10 = vld [vmem:[%s5616_s3 + $0x518] sm:$0xf] }
 0x2b1   :  { %v3334_v13 = vor.u32 %v3856_v6, %v3331_v29  ;;  %v3410_v14 = vor.u32 %v3878_v11, %v3409_v10  ;;  %v3879_v6 = vld [vmem:[%s5616_s3 + $0x534] sm:$0xf0]  ;;  %v3393_v10 = vld [vmem:[%s5616_s3 + $0x4f0] sm:$0xf]  ;;  %v3873_v11 = vld [vmem:[%s5616_s3 + $0x504] sm:$0xf0] }
 0x2b2   :  { %2005 = vmatpush.bf16.msra.mxu0 %v3426_v20  ;;  %v3515_v20 = vld [vmem:[%s5616_s3 + $0x5f8] sm:$0xf0] }
 0x2b3   :  { %1654 = vmatpush.bf16.msrb.mxu3 %v3129_v2  ;;  %v3403_v2 = vld [vmem:[%s5616_s3 + $0x528] sm:$0xf0] }
 0x2b4   :  { %1667 = vmatpush.bf16.msrb.mxu1 %v3133_v27  ;;  %v3402_v27 = vor.u32 %v3877_v24, %v3401_v23  ;;  %v3406_v28 = vor.u32 %v3874_v26, %v3403_v2  ;;  %v3385_v26 = vld [vmem:[%s5616_s3 + $0x4e8] sm:$0xf]  ;;  %v3872_v2 = vld [vmem:[%s5616_s3 + $0x4fc] sm:$0xf0] }
 0x2b6   :  { %2006 = vmatpush.bf16.msra.mxu0 %v3402_v27  ;;  %2019 = vmatpush.bf16.msrb.mxu2 %v3406_v28  ;;  %v3386_v27 = vor.u32 %v3872_v2, %v3385_v26  ;;  %v3387_v28 = vld [vmem:[%s5616_s3 + $0x500] sm:$0xf0]  ;;  %v3345_v26 = vld [vmem:[%s5616_s3 + $0x490] sm:$0xf]  ;;  %v3861_v2 = vld [vmem:[%s5616_s3 + $0x4a4] sm:$0xf0] }
 0x2b7   :  { %1655 = vmatpush.bf16.msrb.mxu3 %v3105_v34  ;;  %v900_v36 = vpop.f32.mrf.mxu1  ;;  %v3482_v34 = vor.u32 %v3896_v32, %v3481_v30  ;;  %v3489_v30 = vld [vmem:[%s5616_s3 + $0x5b0] sm:$0xf]  ;;  %v3897_v32 = vld [vmem:[%s5616_s3 + $0x5c4] sm:$0xf0] }
 0x2b8   :  { %1668 = vmatpush.bf16.msrb.mxu1 %v3109_v35  ;;  %v3483_v35 = vld [vmem:[%s5616_s3 + $0x5c0] sm:$0xf0] }
 0x2ba   :  { %1656 = vmatmul.bf16.vlgmr.msrb.gmra.mxu3 %v4639_v44 }
 0x2bb   :  { %1669 = vmatmul.bf16.vlgmr.msrb.gmra.mxu1 %v4639_v44  ;;  %2028 = vmatpush.bf16.msra.mxu3 %v3506_v18  ;;  %v3513_v18 = vld [vmem:[%s5616_s3 + $0x5e0] sm:$0xf] }
 0x2bc   :  { %2041 = vmatpush.bf16.msra.mxu1 %v3510_v21  ;;  %v3900_v21 = vld [vmem:[%s5616_s3 + $0x5e4] sm:$0xf] }
 0x2bd   :  { %v887_v37 = vpop.f32.mrf.mxu3  ;;  %v3518_v24 = vor.u32 %v3900_v21, %v3515_v20  ;;  %v3864_v21 = vld [vmem:[%s5616_s3 + $0x4c4] sm:$0xf] }
 0x2be   :  { %v913_v38 = vpop.f32.mrf.mxu2 }
 0x2bf   :  { %v902_v39 = vpop.f32.mrf.mxu1  ;;  %2029 = vmatpush.bf16.msra.mxu3 %v3482_v34 }
 0x2c0   :  { %v3868_v39 = vld [vmem:[%s5616_s3 + $0x4e4] sm:$0xf] }
 0x2c1   :  { %v5130_v4 = vpop.f32.mrf.mxu0 }
 0x2c5   :  { %v889_v9 = vpop.f32.mrf.mxu3 }
 0x2c6   :  { %v915_v40 = vpop.f32.mrf.mxu2 }
 0x2c7   :  { %v5132_v42 = vpop.f32.mrf.mxu1 }
 0x2c9   :  { %v1646_v43 = vpop.f32.mrf.mxu0 }
 0x2ca   :  { %v3379_v43 = vld [vmem:[%s5616_s3 + $0x4f8] sm:$0xf0] }
 0x2cd   :  { %v5134_v45 = vpop.f32.mrf.mxu3 }
 0x2ce   :  { %v5136_v46 = vpop.f32.mrf.mxu2 }
 0x2cf   :  { %v941_v47 = vpop.f32.mrf.mxu1 }
 0x2d0   :  { %v3457_v47 = vld [vmem:[%s5616_s3 + $0x578] sm:$0xf] }
 0x2d5   :  { %v928_v17 = vpop.f32.mrf.mxu3 }
 0x2d6   :  { %v954_v48 = vpop.f32.mrf.mxu2  ;;  %v3890_v17 = vld [vmem:[%s5616_s3 + $0x58c] sm:$0xf0] }
 0x2d8   :  { %v1218_v49 = vpop.f32.mrf.mxu1 }
 0x2d9   :  { %v5138_v44 = vadd.f32 %v1218_v49, %v900_v36  ;;  %v3486_v36 = vor.u32 %v3893_v33, %v3483_v35  ;;  %v3382_v49 = vor.u32 %v3868_v39, %v3379_v43  ;;  %v3490_v35 = vor.u32 %v3897_v32, %v3489_v30  ;;  %v3863_v43 = vld [vmem:[%s5616_s3 + $0x4bc] sm:$0xf]  ;;  %v3347_v32 = vld [vmem:[%s5616_s3 + $0x4a8] sm:$0xf0] }
 0x2da   :  { %v3346_v30 = vor.u32 %v3861_v2, %v3345_v26  ;;  %v3948_v26 = vld [vmem:[%s5617_s4 + $0x160] sm:$0xff]  ;;  %v3938_v2 = vld [vmem:[%s5617_s4 + $0x110] sm:$0xff] }
 0x2db   :  { %2042 = vmatpush.bf16.msra.mxu1 %v3486_v36  ;;  %2020 = vmatpush.bf16.msrb.mxu2 %v3382_v49  ;;  %v3894_v36 = vld [vmem:[%s5616_s3 + $0x5b4] sm:$0xf] }
 0x2dd   :  { %v1205_v50 = vpop.f32.mrf.mxu3 }
 0x2de   :  { %v5149_v54 = vadd.f32 %v1205_v50, %v887_v37  ;;  %v3377_v37 = vld [vmem:[%s5616_s3 + $0x4e0] sm:$0xf]  ;;  %v3458_v50 = vor.u32 %v3890_v17, %v3457_v47  ;;  %v3363_v47 = vld [vmem:[%s5616_s3 + $0x4d0] sm:$0xf0] }
 0x2df   :  { %v1231_v55 = vpop.f32.mrf.mxu2  ;;  %2043 = vmatpush.bf16.msra.mxu1 %v3462_v53  ;;  %2021 = vmatpush.bf16.msrb.mxu2 %v3358_v62  ;;  %v3366_v49 = vor.u32 %v3863_v43, %v3363_v47  ;;  %v3441_v62 = vld [vmem:[%s5616_s3 + $0x550] sm:$0xf]  ;;  %v3908_v43 = vld [vmem:[%s5617_s4 + $0x20] sm:$0xff] }
 0x2e0   :  { %v5154_v58 = vadd.f32 %v1231_v55, %v913_v38  ;;  %v1220_v60 = vpop.f32.mrf.mxu1  ;;  %v3871_v38 = vld [vmem:[%s5616_s3 + $0x4f4] sm:$0xf0]  ;;  %2030 = vmatpush.bf16.msra.mxu3 %v3458_v50  ;;  %v3353_v55 = vld [vmem:[%s5616_s3 + $0x4b0] sm:$0xf]  ;;  %v3465_v50 = vld [vmem:[%s5616_s3 + $0x580] sm:$0xf] }
 0x2e1   :  { %v3378_v40 = vor.u32 %v3871_v38, %v3377_v37  ;;  %v3433_v60 = vld [vmem:[%s5616_s3 + $0x548] sm:$0xf]  ;;  %v3491_v37 = vld [vmem:[%s5616_s3 + $0x5c8] sm:$0xf0]  ;;  %v3361_v38 = vld [vmem:[%s5616_s3 + $0x4b8] sm:$0xf]  ;;  %v3466_v53 = vor.u32 %v3891_v51, %v3465_v50 }
 0x2e2   :  { %v3434_v25 = vor.u32 %v3884_v61, %v3433_v60  ;;  %v3339_v61 = vld [vmem:[%s5616_s3 + $0x4a0] sm:$0xf0]  ;;  %v3935_v51 = vld [vmem:[%s5617_s4 + $0xf8] sm:$0xff] }
 0x2e3   :  { %2007 = vmatpush.bf16.msra.mxu0 %v3378_v40  ;;  %2022 = vmatpush.bf16.msrb.mxu2 %v3334_v13  ;;  %v3866_v40 = vld [vmem:[%s5616_s3 + $0x4cc] sm:$0xf0]  ;;  %v3394_v13 = vor.u32 %v3873_v11, %v3393_v10  ;;  %v3916_v47 = vld [vmem:[%s5617_s4 + $0x60] sm:$0xff]  ;;  %v3923_v11 = vld [vmem:[%s5617_s4 + $0x98] sm:$0xff] }
 0x2e4   :  { %2031 = vmatpush.bf16.msra.mxu3 %v3434_v25  ;;  %v3362_v17 = vor.u32 %v3866_v40, %v3361_v38  ;;  %v3885_v25 = vld [vmem:[%s5616_s3 + $0x564] sm:$0xf0]  ;;  %v3918_v38 = vld [vmem:[%s5617_s4 + $0x70] sm:$0xff] }
 0x2e5   :  { %v1207_v63 = vpop.f32.mrf.mxu3  ;;  %v3917_v40 = vld [vmem:[%s5617_s4 + $0x68] sm:$0xff]  ;;  %v3942_v10 = vld [vmem:[%s5617_s4 + $0x130] sm:$0xff] }
 0x2e6   :  { %v3881_v63 = vld [vmem:[%s5616_s3 + $0x54c] sm:$0xf] }
 0x2e7   :  { %v1233_v5 = vpop.f32.mrf.mxu2  ;;  %v3438_v3 = vor.u32 %v3881_v63, %v3435_v0  ;;  %2067 = vmatpush.bf16.msra.mxu2 %v3518_v24  ;;  %v3342_v63 = vor.u32 %v3857_v59, %v3339_v61  ;;  %v3442_v0 = vor.u32 %v3885_v25, %v3441_v62  ;;  %v3926_v61 = vld [vmem:[%s5617_s4 + $0xb0] sm:$0xff]  ;;  %v3933_v25 = vld [vmem:[%s5617_s4 + $0xe8] sm:$0xff] }
 0x2e8   :  { %v3859_v5 = vld [vmem:[%s5616_s3 + $0x494] sm:$0xf0]  ;;  %2032 = vmatpush.bf16.msra.mxu3 %v3410_v14  ;;  %v3395_v14 = vld [vmem:[%s5616_s3 + $0x508] sm:$0xf0]  ;;  %v3914_v62 = vld [vmem:[%s5617_s4 + $0x50] sm:$0xff] }
 0x2e9   :  { %v3330_v8 = vor.u32 %v3859_v5, %v3329_v41  ;;  %2044 = vmatpush.bf16.msra.mxu1 %v3438_v3  ;;  %v3443_v3 = vld [vmem:[%s5616_s3 + $0x568] sm:$0xf0]  ;;  %v3417_v5 = vld [vmem:[%s5616_s3 + $0x520] sm:$0xf] }
 0x2ec   :  { %2033 = vmatpush.bf16.msra.mxu3 %v3386_v27 }
 0x2ed   :  { %2045 = vmatpush.bf16.msra.mxu1 %v3414_v19  ;;  %v3369_v19 = vld [vmem:[%s5616_s3 + $0x4c0] sm:$0xf] }
 0x2f0   :  { %2034 = vmatpush.bf16.msra.mxu3 %v3362_v17 }
 0x2f8   :  { %v1257_v9 = vpop.f32.mrf.mxu1 }
 0x2f9   :  { %v5247_v48 = vadd.f32 %v1257_v9, %v5132_v42  ;;  %v3865_v42 = vld [vmem:[%s5616_s3 + $0x4c4] sm:$0xf0]  ;;  %v3494_v9 = vor.u32 %v3894_v36, %v3491_v37  ;;  %v3919_v36 = vld [vmem:[%s5617_s4 + $0x78] sm:$0xff] }
 0x2fa   :  { %v3354_v57 = vor.u32 %v3865_v42, %v3353_v55  ;;  %v3467_v55 = vld [vmem:[%s5616_s3 + $0x598] sm:$0xf0] }
 0x2fb   :  { %2068 = vmatpush.bf16.msra.mxu2 %v3494_v9  ;;  %v3470_v42 = vor.u32 %v3888_v52, %v3467_v55  ;;  %v3909_v9 = vld [vmem:[%s5617_s4 + $0x28] sm:$0xff]  ;;  %v3907_v52 = vld [vmem:[%s5617_s4 + $0x18] sm:$0xff] }
 0x2fc   :  { %2008 = vmatpush.bf16.msra.mxu0 %v3354_v57  ;;  %v3860_v57 = vld [vmem:[%s5616_s3 + $0x49c] sm:$0xf0]  ;;  %v3915_v55 = vld [vmem:[%s5617_s4 + $0x58] sm:$0xff] }
 0x2fd   :  { %v1244_v1 = vpop.f32.mrf.mxu3  ;;  %v3338_v60 = vor.u32 %v3860_v57, %v3337_v56  ;;  %v3934_v56 = vld [vmem:[%s5617_s4 + $0xf0] sm:$0xff] }
 0x2fe   :  { %v1245_v7 = vadd.f32 %v1244_v1, %v5134_v45  ;;  %v3882_v1 = vld [vmem:[%s5616_s3 + $0x554] sm:$0xf] }
 0x2ff   :  { %v1270_v31 = vpop.f32.mrf.mxu2  ;;  %2069 = vmatpush.bf16.msra.mxu2 %v3470_v42  ;;  %2035 = vmatpush.bf16.msra.mxu3 %v3338_v60  ;;  %v3446_v41 = vor.u32 %v3882_v1, %v3443_v3  ;;  %v3906_v57 = vld [vmem:[%s5617_s4 + $0x10] sm:$0xff] }
 0x300   :  { %v5299_v12 = vadd.f32 %v1270_v31, %v5136_v46  ;;  %v1259_v45 = vpop.f32.mrf.mxu1  ;;  %v3903_v46 = vld [vmem:[%s5616_s3 + $0x5f4] sm:$0xf0]  ;;  %v5320_v22 = vadd.f32 %v5130_v4, %v1245_v7  ;;  %2009 = vmatpush.bf16.msra.mxu0 %v3330_v8  ;;  %v3869_v4 = vld [vmem:[%s5616_s3 + $0x4ec] sm:$0xf]  ;;  %v3876_v7 = vld [vmem:[%s5616_s3 + $0x524] sm:$0xf]  ;;  %v3418_v31 = vor.u32 %v3879_v6, %v3417_v5 }
 0x301   :  { %v3514_v23 = vor.u32 %v3903_v46, %v3513_v18  ;;  %v3390_v34 = vor.u32 %v3869_v4, %v3387_v28  ;;  %v3419_v8 = vld [vmem:[%s5616_s3 + $0x538] sm:$0xf0]  ;;  %v3870_v45 = vld [vmem:[%s5616_s3 + $0x4f4] sm:$0xf]  ;;  %v3867_v46 = vld [vmem:[%s5616_s3 + $0x4d4] sm:$0xf0] }
 0x302   :  { %v3422_v29 = vor.u32 %v3876_v7, %v3419_v8  ;;  %v3398_v16 = vor.u32 %v3870_v45, %v3395_v14  ;;  %v3370_v20 = vor.u32 %v3867_v46, %v3369_v19  ;;  %v3858_v4 = vld [vmem:[%s5616_s3 + $0x494] sm:$0xf]  ;;  %v3932_v5 = vld [vmem:[%s5617_s4 + $0xe0] sm:$0xff]  ;;  %v3943_v7 = vld [vmem:[%s5617_s4 + $0x138] sm:$0xff] }
 0x303   :  { %2046 = vmatpush.bf16.msra.mxu1 %v3390_v34  ;;  %2070 = vmatpush.bf16.msra.mxu2 %v3446_v41  ;;  %v3350_v34 = vor.u32 %v3858_v4, %v3347_v32  ;;  %v3904_v6 = vld [vmem:[%s5617_s4] sm:$0xff]  ;;  %v3931_v8 = vld [vmem:[%s5617_s4 + $0xd8] sm:$0xff]  ;;  %v3929_v14 = vld [vmem:[%s5617_s4 + $0xc8] sm:$0xff] }
 0x304   :  { %2054 = vmatpush.bf16.msrb.mxu0 %v3514_v23  ;;  %v3950_v19 = vld [vmem:[%s5617_s4 + $0x170] sm:$0xff]  ;;  %v3928_v46 = vld [vmem:[%s5617_s4 + $0xc0] sm:$0xff]  ;;  %v3947_v4 = vld [vmem:[%s5617_s4 + $0x158] sm:$0xff] }
 0x305   :  { %v1246_v33 = vpop.f32.mrf.mxu3  ;;  %v3936_v32 = vld [vmem:[%s5617_s4 + $0x100] sm:$0xff] }
 0x307   :  { %v1272_v39 = vpop.f32.mrf.mxu2  ;;  %2047 = vmatpush.bf16.msra.mxu1 %v3366_v49  ;;  %2071 = vmatpush.bf16.msra.mxu2 %v3422_v29  ;;  %v3951_v29 = vld [vmem:[%s5617_s4 + $0x178] sm:$0xff] }
 0x308   :  { %2055 = vmatpush.bf16.msrb.mxu0 %v3490_v35 }
 0x30b   :  { %2048 = vmatpush.bf16.msra.mxu1 %v3342_v63  ;;  %2072 = vmatpush.bf16.msra.mxu2 %v3398_v16  ;;  %v3925_v63 = vld [vmem:[%s5617_s4 + $0xa8] sm:$0xff]  ;;  %v3922_v16 = vld [vmem:[%s5617_s4 + $0x90] sm:$0xff] }
 0x30c   :  { %2056 = vmatpush.bf16.msrb.mxu0 %v3466_v53  ;;  %v3927_v53 = vld [vmem:[%s5617_s4 + $0xb8] sm:$0xff] }
 0x30f   :  { %2499 = vmatpush.bf16.msrb.mxu1 %v3919_v36 }
 0x310   :  { %2057 = vmatpush.bf16.msrb.mxu0 %v3442_v0  ;;  %v3913_v0 = vld [vmem:[%s5617_s4 + $0x48] sm:$0xff] }
 0x313   :  { %2500 = vmatpush.bf16.msrb.mxu1 %v3918_v38 }
 0x314   :  { %2058 = vmatpush.bf16.msrb.mxu0 %v3418_v31  ;;  %v3912_v31 = vld [vmem:[%s5617_s4 + $0x40] sm:$0xff] }
 0x317   :  { %2501 = vmatpush.bf16.msrb.mxu1 %v3917_v40 }
 0x318   :  { %v1618_v15 = vpop.f32.mrf.mxu1  ;;  %2059 = vmatpush.bf16.msrb.mxu0 %v3394_v13  ;;  %v3930_v13 = vld [vmem:[%s5617_s4 + $0xd0] sm:$0xff] }
 0x319   :  { %v5419_v18 = vadd.f32 %v1618_v15, %v5138_v44  ;;  %v3371_v44 = vld [vmem:[%s5616_s3 + $0x4d8] sm:$0xf0]  ;;  %v3941_v15 = vld [vmem:[%s5617_s4 + $0x128] sm:$0xff] }
 0x31a   :  { %v3374_v23 = vor.u32 %v3864_v21, %v3371_v44  ;;  %v3940_v21 = vld [vmem:[%s5617_s4 + $0x120] sm:$0xff]  ;;  %v3949_v44 = vld [vmem:[%s5617_s4 + $0x168] sm:$0xff] }
 0x31b   :  { %2502 = vmatpush.bf16.msrb.mxu1 %v3916_v47 }
 0x31c   :  { %2060 = vmatpush.bf16.msrb.mxu0 %v3370_v20  ;;  %2073 = vmatpush.bf16.msra.mxu2 %v3374_v23  ;;  %v3921_v20 = vld [vmem:[%s5617_s4 + $0x88] sm:$0xff]  ;;  %v3939_v23 = vld [vmem:[%s5617_s4 + $0x118] sm:$0xff] }
 0x31d   :  { %v1605_v24 = vpop.f32.mrf.mxu3 }
 0x31e   :  { %v5443_v27 = vadd.f32 %v1605_v24, %v5149_v54  ;;  %v3911_v54 = vld [vmem:[%s5617_s4 + $0x38] sm:$0xff]  ;;  %v3920_v24 = vld [vmem:[%s5617_s4 + $0x80] sm:$0xff] }
 0x31f   :  { %v1631_v28 = vpop.f32.mrf.mxu2  ;;  %2486 = vmatpush.bf16.msrb.mxu3 %v3911_v54  ;;  %2503 = vmatpush.bf16.msrb.mxu1 %v3915_v55 }
 0x320   :  { %v5449_v33 = vadd.f32 %v1631_v28, %v5154_v58  ;;  %v1620_v35 = vpop.f32.mrf.mxu1  ;;  %2061 = vmatpush.bf16.msrb.mxu0 %v3346_v30  ;;  %2074 = vmatpush.bf16.msra.mxu2 %v3350_v34  ;;  %v3910_v58 = vld [vmem:[%s5617_s4 + $0x30] sm:$0xff]  ;;  %v3937_v28 = vld [vmem:[%s5617_s4 + $0x108] sm:$0xff] }
 0x321   :  { %v3946_v30 = vld [vmem:[%s5617_s4 + $0x150] sm:$0xff]  ;;  %v3945_v34 = vld [vmem:[%s5617_s4 + $0x148] sm:$0xff]  ;;  %v3944_v35 = vld [vmem:[%s5617_s4 + $0x140] sm:$0xff] }
 0x323   :  { %2487 = vmatpush.bf16.msrb.mxu3 %v3910_v58  ;;  %2504 = vmatpush.bf16.msrb.mxu1 %v3914_v62 }
 0x325   :  { %v1607_v37 = vpop.f32.mrf.mxu3 }
 0x327   :  { %v1633_v39 = vpop.f32.mrf.mxu2  ;;  %2488 = vmatpush.bf16.msrb.mxu3 %v3909_v9  ;;  %2505 = vmatpush.bf16.msrb.mxu1 %v3913_v0  ;;  %v3992_v0 = vld [vmem:[%s5618_s5] ss:$0 sm:$0xff] }
 0x32b   :  { %2489 = vmatpush.bf16.msrb.mxu3 %v3908_v43  ;;  %2506 = vmatpush.bf16.msrb.mxu1 %v3912_v31 }
 0x32f   :  { %v1707_v17 = vpop.f32.mrf.mxu2  ;;  %2490 = vmatpush.bf16.msrb.mxu3 %v3907_v52 }
 0x330   :  { %v1711_v49 = vmax.f32 %v1707_v17, 0.0 }
 0x332   :  { %v1712_v50 = vpack.c.bf16 %v1711_v49, %v1711_v49 }
 0x333   :  { %2491 = vmatpush.bf16.msrb.mxu3 %v3906_v57 }
 0x334   :  { %2010 = vmatmul.bf16.vlgmr.msra.gmra.mxu0 %v1712_v50  ;;  %2023 = vmatmul.bf16.vlgmr.msrb.gmra.mxu2 %v1712_v50 }
 0x335   :  { %2036 = vmatmul.bf16.vlgmr.msra.gmra.mxu3 %v1712_v50  ;;  %2049 = vmatmul.bf16.vlgmr.msra.gmra.mxu1 %v1712_v50 }
 0x336   :  { %2525 = vmatpush.bf16.msrb.mxu2 %v3935_v51  ;;  %2512 = vmatpush.bf16.msra.mxu0 %v3927_v53 }
 0x337   :  { %v1709_v60 = vpop.f32.mrf.mxu2  ;;  %2551 = vmatpush.bf16.msra.mxu1 %v3951_v29 }
 0x338   :  { %v1670_v42 = vpop.f32.mrf.mxu1 }
 0x339   :  { %v5494_v59 = vadd.f32 %v1670_v42, %v5299_v12  ;;  %v3905_v12 = vld [vmem:[%s5617_s4 + $0x8] sm:$0xff] }
 0x33a   :  { %2526 = vmatpush.bf16.msrb.mxu2 %v3934_v56  ;;  %2513 = vmatpush.bf16.msra.mxu0 %v3926_v61 }
 0x33b   :  { %2492 = vmatpush.bf16.msrb.mxu3 %v3905_v12  ;;  %2552 = vmatpush.bf16.msra.mxu1 %v3950_v19 }
 0x33d   :  { %v1657_v1 = vpop.f32.mrf.mxu3 }
 0x33e   :  { %v5515_v3 = vadd.f32 %v1657_v1, %v5247_v48  ;;  %2527 = vmatpush.bf16.msrb.mxu2 %v3933_v25  ;;  %2514 = vmatpush.bf16.msra.mxu0 %v3925_v63  ;;  %v3924_v48 = vld [vmem:[%s5617_s4 + $0xa0] sm:$0xff] }
 0x33f   :  { %2493 = vmatpush.bf16.msrb.mxu3 %v3904_v6  ;;  %2553 = vmatpush.bf16.msra.mxu1 %v3949_v44 }
 0x340   :  { %v1672_v41 = vpop.f32.mrf.mxu1 }
 0x342   :  { %2528 = vmatpush.bf16.msrb.mxu2 %v3932_v5  ;;  %2515 = vmatpush.bf16.msra.mxu0 %v3924_v48 }
 0x343   :  { %2538 = vmatpush.bf16.msra.mxu3 %v3943_v7  ;;  %2554 = vmatpush.bf16.msra.mxu1 %v3948_v26 }
 0x344   :  { %2062 = vmatmul.bf16.vlgmr.msrb.gmra.mxu0 %v1712_v50  ;;  %2075 = vmatmul.bf16.vlgmr.msra.gmra.mxu2 %v1712_v50 }
 0x345   :  { %v1659_v45 = vpop.f32.mrf.mxu3 }
 0x346   :  { %2529 = vmatpush.bf16.msrb.mxu2 %v3931_v8  ;;  %2516 = vmatpush.bf16.msra.mxu0 %v3923_v11 }
 0x347   :  { %2539 = vmatpush.bf16.msra.mxu3 %v3942_v10  ;;  %2555 = vmatpush.bf16.msra.mxu1 %v3947_v4 }
 0x34a   :  { %2530 = vmatpush.bf16.msrb.mxu2 %v3930_v13  ;;  %2517 = vmatpush.bf16.msra.mxu0 %v3922_v16 }
 0x34b   :  { %2540 = vmatpush.bf16.msra.mxu3 %v3941_v15  ;;  %2556 = vmatpush.bf16.msra.mxu1 %v3946_v30 }
 0x34e   :  { %2531 = vmatpush.bf16.msrb.mxu2 %v3929_v14  ;;  %2518 = vmatpush.bf16.msra.mxu0 %v3921_v20 }
 0x34f   :  { %2541 = vmatpush.bf16.msra.mxu3 %v3940_v21  ;;  %2557 = vmatpush.bf16.msra.mxu1 %v3945_v34 }
 0x352   :  { %2532 = vmatpush.bf16.msrb.mxu2 %v3928_v46  ;;  %2519 = vmatpush.bf16.msra.mxu0 %v3920_v24 }
 0x353   :  { %2542 = vmatpush.bf16.msra.mxu3 %v3939_v23  ;;  %2558 = vmatpush.bf16.msra.mxu1 %v3944_v35 }
 0x357   :  { %2543 = vmatpush.bf16.msra.mxu3 %v3938_v2 }
 0x35b   :  { %2544 = vmatpush.bf16.msra.mxu3 %v3937_v28 }
 0x35f   :  { %2545 = vmatpush.bf16.msra.mxu3 %v3936_v32 }
 0x3b1   :  { %v2011_v54 = vpop.f32.mrf.mxu0 }
 0x3b2   :  { %v2080_v36 = vadd.f32 %v2011_v54, %v5443_v27  ;;  %v2050_v37 = vpop.f32.mrf.mxu1 }
 0x3b3   :  { %v2083_v58 = vadd.f32 %v2050_v37, %v5320_v22 }
 0x3b4   :  { %v2086_v38 = vmax.f32 %v2080_v36, 0.0 }
 0x3b5   :  { %v2089_v39 = vmax.f32 %v2083_v58, 0.0 }
 0x3b6   :  { %v2092_v9 = vpack.c.bf16 %v2086_v38, %v2086_v38 }
 0x3b7   :  { %v2095_v40 = vpack.c.bf16 %v2089_v39, %v2089_v39  ;;  %v2024_v43 = vpop.f32.mrf.mxu2 }
 0x3b8   :  { %v2081_v47 = vadd.f32 %v2024_v43, %v5419_v18  ;;  %v2037_v17 = vpop.f32.mrf.mxu3  ;;  %2494 = vmatmul.bf16.vlgmr.msrb.gmra.mxu3 %v2092_v9 }
 0x3b9   :  { %v2082_v49 = vadd.f32 %v2037_v17, %v5449_v33  ;;  %2533 = vmatmul.bf16.vlgmr.msrb.gmra.mxu2 %v2095_v40  ;;  %v2013_v50 = vpop.f32.mrf.mxu0 }
 0x3ba   :  { %v2087_v51 = vmax.f32 %v2081_v47, 0.0  ;;  %v2052_v52 = vpop.f32.mrf.mxu1 }
 0x3bb   :  { %v2088_v53 = vmax.f32 %v2082_v49, 0.0 }
 0x3bc   :  { %v2093_v27 = vpack.c.bf16 %v2087_v51, %v2087_v51 }
 0x3bd   :  { %v2094_v55 = vpack.c.bf16 %v2088_v53, %v2088_v53 }
 0x3be   :  { %2507 = vmatmul.bf16.vlgmr.msrb.gmra.mxu1 %v2093_v27 }
 0x3bf   :  { %2520 = vmatmul.bf16.vlgmr.msra.gmra.mxu0 %v2094_v55  ;;  %v2026_v22 = vpop.f32.mrf.mxu2 }
 0x3c0   :  { %v2039_v42 = vpop.f32.mrf.mxu3 }
 0x3c1   :  { %v2063_v56 = vpop.f32.mrf.mxu0 }
 0x3c2   :  { %v2084_v57 = vadd.f32 %v2063_v56, %v5515_v3 }
 0x3c4   :  { %v2090_v60 = vmax.f32 %v2084_v57, 0.0 }
 0x3c6   :  { %v2096_v18 = vpack.c.bf16 %v2090_v60, %v2090_v60 }
 0x3c7   :  { %v2076_v61 = vpop.f32.mrf.mxu2 }
 0x3c8   :  { %v2085_v62 = vadd.f32 %v2076_v61, %v5494_v59  ;;  %2546 = vmatmul.bf16.vlgmr.msra.gmra.mxu3 %v2096_v18 }
 0x3c9   :  { %v2065_v33 = vpop.f32.mrf.mxu0 }
 0x3ca   :  { %v2091_v25 = vmax.f32 %v2085_v62, 0.0 }
 0x3cc   :  { %v2097_v12 = vpack.c.bf16 %v2091_v25, %v2091_v25 }
 0x3ce   :  { %2559 = vmatmul.bf16.vlgmr.msra.gmra.mxu1 %v2097_v12 }
 0x3cf   :  { %v2078_v63 = vpop.f32.mrf.mxu2 }
 0x43b   :  { %v2495_v1 = vpop.f32.mrf.mxu3  ;;  %v2508_v41 = vpop.f32.mrf.mxu1 }
 0x43c   :  { %v2521_v5 = vpop.f32.mrf.mxu0  ;;  %v2534_v6 = vpop.f32.mrf.mxu2  ;;  %v2496_v3 = vadd.f32 %v3992_v0, %v2495_v1 }
 0x43e   :  { %v2509_v7 = vadd.f32 %v2508_v41, %v2496_v3 }
 0x440   :  { %v2522_v29 = vadd.f32 %v2521_v5, %v2509_v7 }
 0x442   :  { %v2535_v10 = vadd.f32 %v2534_v6, %v2522_v29 }
 0x443   :  { %v2497_v48 = vpop.f32.mrf.mxu3  ;;  %v2510_v31 = vpop.f32.mrf.mxu1 }
 0x444   :  { %v2523_v8 = vpop.f32.mrf.mxu0  ;;  %v2536_v59 = vpop.f32.mrf.mxu2 }
 0x44b   :  { %v2547_v11 = vpop.f32.mrf.mxu3  ;;  %v2560_v45 = vpop.f32.mrf.mxu1 }
 0x44c   :  { %v2548_v13 = vadd.f32 %v2547_v11, %v2535_v10 }
 0x44e   :  { %v2561_v14 = vadd.f32 %v2560_v45, %v2548_v13 }
 0x450   :  { %2564 = vst [vmem:[#allocation2] sm:$0xff] %v2561_v14 }
 0x453   :  { %v2549_v15 = vpop.f32.mrf.mxu3  ;;  %v2562_v16 = vpop.f32.mrf.mxu1 }
 0x454   :  { %2568 = vsyncadd [#allocation3], 96  ;;  %s2571_s15 = sshll.u32 %s5619_s6, 4  ;;  %s4020_s16 = smov [#allocation2]   ;;  %s2572_s15 = int_to_ptr.hbm [resolvable:$true] %s2571_s15 }
 0x455   :  { %s2569_s17 = sshll.u32 %s4020_s16, 4  ;;  %s4021_s18 = smov 32   ;;  %s2570_s17 = int_to_ptr.vmem [resolvable:$true] %s2569_s17 }
 0x456   :  { %s4022_s1 = smov 2  }
 0x457   :  { %2577 = dma.vmem_to_hbm [thread:$0]  %s2570_s17, 32, %s2572_s15, [#allocation3], %s4021_s18, %s4021_s18, %s4022_s1  }
 0x458   :  { %4018 = dma.done.wait [#allocation3], 128  }
 0x459   :  { %4019 = vsyncadd [#allocation3], 4294967168 }
 0x45a   :  { %2582 = vsyncpa [#allocation3], 1 }

</bundles_post_ra>
